<compile_context>
chip_gen: v7x
topology: tpu7x:2x2x1
jax: 0.10.0
libtpu: 0.0.40
codegen_flags: <defaults>
</compile_context>

<pallas_src>
import functools

import jax
import jax.numpy as jnp
from jax import lax
from jax.experimental import pallas as pl
from jax.experimental.pallas import tpu as pltpu


def _mbconv_conv_kernel(H, W, Ho, Wo, stride,
                        x_ref, w1_ref, b1_ref, wdw_ref, bdw_ref,
                        w2_ref, b2_ref, y_ref, stats_ref):
    Bblk, Cin, HW = x_ref.shape
    Cmid = w1_ref.shape[0]
    Cout = w2_ref.shape[0]
    HWo = Ho * Wo

    x = x_ref[...]           # (Bblk, Cin, H*W)  spatial flattened into lanes
    w1 = w1_ref[...]         # (Cmid, Cin)       weight loads hoisted (once)
    wdw = wdw_ref[...]       # (Cmid, 9)
    w2 = w2_ref[...]         # (Cout, Cmid)

    # ---- 1x1 expansion conv + ReLU6 (vectorized over the image block) -----
    # K = Cin is tiny -> unrolled rank-1 VPU FMAs; first term initializes the
    # accumulator (no zeros+add).
    h = w1[:, 0:1] * x[:, 0:1, :]
    for c in range(1, Cin):
        h = h + w1[:, c:c + 1] * x[:, c:c + 1, :]
    h = jnp.clip(h + b1_ref[...], 0.0, 6.0)           # (Bblk, Cmid, HW)

    # ---- in-kernel boundary masks (no (9, HW) mask operand / DMA) ----------
    pos = lax.broadcasted_iota(jnp.int32, (1, HW), 1)  # flat spatial index
    if (W & (W - 1)) == 0:
        col = jnp.bitwise_and(pos, W - 1)              # pos % W, pow2 fast path
    else:
        col = lax.rem(pos, W)  # TODO(synk): pass col from host if rem lowering is slow
    row_lo = pos >= W                                  # valid when oy == -1
    row_hi = pos < (H - 1) * W                         # valid when oy == +1
    col_lo = col >= 1                                  # valid when ox == -1
    col_hi = col <= W - 2                              # valid when ox == +1

    def tap_mask(oy, ox):
        m = None
        if oy == -1:
            m = row_lo
        elif oy == 1:
            m = row_hi
        if ox == -1:
            m = col_lo if m is None else jnp.logical_and(m, col_lo)
        elif ox == 1:
            m = col_hi if m is None else jnp.logical_and(m, col_hi)
        return m

    # ---- 3x3 depthwise conv, padding=1 ------------------------------------
    # In-register shifted taps (lane rolls) masked at the image boundary.
    # Kept 2-D per image (validated lowering path); unrolled over Bblk.
    d_list = []
    for b in range(Bblk):
        hb = h[b]                                      # (Cmid, HW)
        db = None
        for k in range(9):
            oy, ox = k // 3 - 1, k % 3 - 1
            if oy == 0 and ox == 0:
                tap = hb
            else:
                shift = (-(oy * W + ox)) % HW          # tap[p] = h[p + oy*W + ox]
                tap = pltpu.roll(hb, shift, axis=1)
                tap = jnp.where(tap_mask(oy, ox), tap, 0.0)
            term = tap * wdw[:, k:k + 1]
            db = term if db is None else db + term
        if stride > 1:
            # Strided subsample of the full-resolution result (replaces the
            # old dense (HW, HWo) selection matmul; O(Cmid*HWo) instead).
            db = lax.slice(db.reshape(Cmid, H, W), (0, 0, 0), (Cmid, H, W),
                           (1, stride, stride)).reshape(Cmid, HWo)
        d_list.append(db)
    d = jnp.stack(d_list, axis=0)                      # (Bblk, Cmid, HWo)
    d = jnp.clip(d + bdw_ref[...], 0.0, 6.0)

    # ---- 1x1 projection conv (no nonlinearity) -----------------------------
    y = w2[:, 0:1] * d[:, 0:1, :]
    for m_ in range(1, Cmid):
        y = y + w2[:, m_:m_ + 1] * d[:, m_:m_ + 1, :]
    y = y + b2_ref[...]

    y_ref[...] = y                                     # lane-dense (Bblk, Cout, HWo)
    # Single-pass BatchNorm partials, merged into one (Bblk, Cout, 2) output.
    stats_ref[:, :, 0:1] = jnp.sum(y, axis=2, keepdims=True)
    stats_ref[:, :, 1:2] = jnp.sum(y * y, axis=2, keepdims=True)


def _bn_apply_kernel(y_ref, scale_ref, shift_ref, o_ref):
    # gamma * (y - mean) * rsqrt(var + eps) + beta, folded into one FMA.
    o_ref[...] = y_ref[...] * scale_ref[...] + shift_ref[...]


@functools.partial(jax.jit, static_argnames=("stride", "eps", "batch_block"))
def mbconv_pallas(x_nchw, params, *, stride=1, eps=1e-5, batch_block=8):
    """x_nchw: (N, Cin, H, W) float32.  Returns (N, Cout, Ho, Wo) float32."""
    N, Cin, H, W = x_nchw.shape
    w1, b1, wdw, bdw, w2, b2, gamma, beta = params
    Cmid = w1.shape[0]
    Cout = w2.shape[0]
    Ho = (H + 2 - 3) // stride + 1
    Wo = (W + 2 - 3) // stride + 1
    HW, HWo = H * W, Ho * Wo

    # Batch-block the grid: Bblk images per step amortize per-step overhead.
    bblk = max(1, min(batch_block, N))
    nb = pl.cdiv(N, bblk)
    n_pad = nb * bblk

    # NCHW is consumed natively; this reshape is metadata-only (no transpose).
    x = x_nchw.reshape(N, Cin, HW).astype(jnp.float32)
    if n_pad != N:
        x = jnp.pad(x, ((0, n_pad - N), (0, 0), (0, 0)))

    def const(shape):
        return pl.BlockSpec(shape, lambda n: (0,) * len(shape))

    kernel = functools.partial(_mbconv_conv_kernel, H, W, Ho, Wo, stride)
    y, stats = pl.pallas_call(
        kernel,
        grid=(nb,),
        in_specs=[
            pl.BlockSpec((bblk, Cin, HW), lambda n: (n, 0, 0)),
            const((Cmid, Cin)), const((Cmid, 1)), const((Cmid, 9)),
            const((Cmid, 1)), const((Cout, Cmid)), const((Cout, 1)),
        ],
        out_specs=(
            pl.BlockSpec((bblk, Cout, HWo), lambda n: (n, 0, 0)),
            pl.BlockSpec((bblk, Cout, 2), lambda n: (n, 0, 0)),
        ),
        out_shape=(
            jax.ShapeDtypeStruct((n_pad, Cout, HWo), jnp.float32),
            jax.ShapeDtypeStruct((n_pad, Cout, 2), jnp.float32),
        ),
        compiler_params=pltpu.CompilerParams(
            dimension_semantics=("parallel",)),
    )(x, w1, b1.reshape(Cmid, 1), wdw, bdw.reshape(Cmid, 1),
      w2, b2.reshape(Cout, 1))

    # BatchNorm2d (training mode): combine per-image partials into batch
    # stats (biased variance) and fold gamma/beta into one scale/shift pair.
    # TODO(synk): running_mean/running_var momentum updates (a training-time
    # side effect of nn.BatchNorm2d) are not reproduced.
    stats = stats[:N]                                   # drop padded images
    count = N * HWo
    mean = jnp.sum(stats[:, :, 0:1], axis=0) / count    # (Cout, 1)
    var = jnp.sum(stats[:, :, 1:2], axis=0) / count - mean * mean
    var = jnp.maximum(var, 0.0)                         # guard f32 cancellation
    scale = gamma.reshape(Cout, 1) * lax.rsqrt(var + eps)
    shift = beta.reshape(Cout, 1) - mean * scale

    out = pl.pallas_call(
        _bn_apply_kernel,
        grid=(nb,),
        in_specs=[
            pl.BlockSpec((bblk, Cout, HWo), lambda n: (n, 0, 0)),
            pl.BlockSpec((Cout, 1), lambda n: (0, 0)),
            pl.BlockSpec((Cout, 1), lambda n: (0, 0)),
        ],
        out_specs=pl.BlockSpec((bblk, Cout, HWo), lambda n: (n, 0, 0)),
        out_shape=jax.ShapeDtypeStruct((n_pad, Cout, HWo), jnp.float32),
        input_output_aliases={0: 0},                    # normalize y in place
        compiler_params=pltpu.CompilerParams(
            dimension_semantics=("parallel",)),
    )(y, scale, shift)

    # Metadata-only reshape; result is already NCHW (no transposes anywhere).
    return out[:N].reshape(N, Cout, Ho, Wo)


def mbconv_reference(x, w1_oihw, b1, wdw_oihw, bdw, w2_oihw, b2,
                     gamma, beta, *, stride=1, eps=1e-5):
    """Pure-JAX reference in NCHW, mirroring the PyTorch module."""
    dn = ("NCHW", "OIHW", "NCHW")
    Cmid = w1_oihw.shape[0]
    h = lax.conv_general_dilated(x, w1_oihw, (1, 1), "VALID",
                                 dimension_numbers=dn)
    h = jnp.clip(h + b1[None, :, None, None], 0.0, 6.0)
    h = lax.conv_general_dilated(h, wdw_oihw, (stride, stride),
                                 ((1, 1), (1, 1)), dimension_numbers=dn,
                                 feature_group_count=Cmid)
    h = jnp.clip(h + bdw[None, :, None, None], 0.0, 6.0)
    y = lax.conv_general_dilated(h, w2_oihw, (1, 1), "VALID",
                                 dimension_numbers=dn)
    y = y + b2[None, :, None, None]
    mean = jnp.mean(y, axis=(0, 2, 3), keepdims=True)
    var = jnp.mean((y - mean) ** 2, axis=(0, 2, 3), keepdims=True)
    yhat = (y - mean) * lax.rsqrt(var + eps)
    return yhat * gamma[None, :, None, None] + beta[None, :, None, None]


if __name__ == "__main__":
    # Module config: kernel_size=3 (unused by the PyTorch code), ch_in=4,
    # ch_out=8, stride=1, expansion_ratio=2, affine=True  ->  Cmid = 8
    N, Cin, H, W = 2, 4, 16, 16
    Cout, expansion, stride = 8, 2, 1
    Cmid = Cin * expansion

    key = jax.random.PRNGKey(0)
    ks = jax.random.split(key, 9)
    # Deterministic synthetic parameters in PyTorch (OIHW) layout.
    w1_oihw = jax.random.normal(ks[0], (Cmid, Cin, 1, 1), jnp.float32) * 0.3
    b1 = jax.random.normal(ks[1], (Cmid,), jnp.float32) * 0.1
    wdw_oihw = jax.random.normal(ks[2], (Cmid, 1, 3, 3), jnp.float32) * 0.3
    bdw = jax.random.normal(ks[3], (Cmid,), jnp.float32) * 0.1
    w2_oihw = jax.random.normal(ks[4], (Cout, Cmid, 1, 1), jnp.float32) * 0.3
    b2 = jax.random.normal(ks[5], (Cout,), jnp.float32) * 0.1
    gamma = 1.0 + jax.random.normal(ks[6], (Cout,), jnp.float32) * 0.1
    beta = jax.random.normal(ks[7], (Cout,), jnp.float32) * 0.1
    x = jax.random.normal(ks[8], (N, Cin, H, W), jnp.float32)

    # Kernel-layout parameters (channel-plane layout; no transposes needed).
    params = (w1_oihw[:, :, 0, 0],                  # (Cmid, Cin)
              b1,
              wdw_oihw[:, 0].reshape(Cmid, 9),      # (Cmid, 9), col = dy*3+dx
              bdw,
              w2_oihw[:, :, 0, 0],                  # (Cout, Cmid)
              b2, gamma, beta)

    out = mbconv_pallas(x, params, stride=stride)
    out = jax.block_until_ready(out)

    ref = mbconv_reference(x, w1_oihw, b1, wdw_oihw, bdw, w2_oihw, b2,
                           gamma, beta, stride=stride)
    ref = jax.block_until_ready(ref)

    assert out.shape == ref.shape == (N, Cout, H // stride, W // stride)
    assert jnp.allclose(out, ref, atol=1e-4, rtol=1e-4), (
        f"max abs err = {jnp.max(jnp.abs(out - ref))}")
    print("KERNEL_OK")
</pallas_src>

<mosaic_0001>
module attributes {stable_mosaic.version = 11 : i64} {
  func.func @_mbconv_conv_kernel(%arg0: i32, %arg1: memref<2x4x256xf32, #tpu.memory_space<vmem>>, %arg2: memref<8x4xf32, #tpu.memory_space<vmem>>, %arg3: memref<8x1xf32, #tpu.memory_space<vmem>>, %arg4: memref<8x9xf32, #tpu.memory_space<vmem>>, %arg5: memref<8x1xf32, #tpu.memory_space<vmem>>, %arg6: memref<8x8xf32, #tpu.memory_space<vmem>>, %arg7: memref<8x1xf32, #tpu.memory_space<vmem>>, %arg8: memref<2x8x256xf32, #tpu.memory_space<vmem>>, %arg9: memref<2x8x2xf32, #tpu.memory_space<vmem>>) attributes {dimension_semantics = [#tpu.dimension_semantics<parallel>], iteration_bounds = array<i64: 1>, scalar_prefetch = 0 : i64, scratch_operands = 0 : i64, tpu.core_type = #tpu.core_type<tc>, window_params = [{transform_indices = @transform_0, window_bounds = array<i64: 2, 4, 256>}, {pipeline_mode = #tpu.pipeline_mode<synchronous>, transform_indices = @transform_1, window_bounds = array<i64: 8, 4>}, {pipeline_mode = #tpu.pipeline_mode<synchronous>, transform_indices = @transform_2, window_bounds = array<i64: 8, 1>}, {pipeline_mode = #tpu.pipeline_mode<synchronous>, transform_indices = @transform_3, window_bounds = array<i64: 8, 9>}, {pipeline_mode = #tpu.pipeline_mode<synchronous>, transform_indices = @transform_4, window_bounds = array<i64: 8, 1>}, {pipeline_mode = #tpu.pipeline_mode<synchronous>, transform_indices = @transform_5, window_bounds = array<i64: 8, 8>}, {pipeline_mode = #tpu.pipeline_mode<synchronous>, transform_indices = @transform_6, window_bounds = array<i64: 8, 1>}, {transform_indices = @transform_7, window_bounds = array<i64: 2, 8, 256>}, {transform_indices = @transform_8, window_bounds = array<i64: 2, 8, 2>}]} {
    %c0 = arith.constant 0 : index
    %c0_0 = arith.constant 0 : index
    %c0_1 = arith.constant 0 : index
    %0 = vector.load %arg1[%c0, %c0_0, %c0_1] : memref<2x4x256xf32, #tpu.memory_space<vmem>>, vector<2x4x256xf32>
    %c0_2 = arith.constant 0 : index
    %c0_3 = arith.constant 0 : index
    %1 = vector.load %arg2[%c0_2, %c0_3] : memref<8x4xf32, #tpu.memory_space<vmem>>, vector<8x4xf32>
    %c0_4 = arith.constant 0 : index
    %c0_5 = arith.constant 0 : index
    %2 = vector.load %arg4[%c0_4, %c0_5] : memref<8x9xf32, #tpu.memory_space<vmem>>, vector<8x9xf32>
    %c0_6 = arith.constant 0 : index
    %c0_7 = arith.constant 0 : index
    %3 = vector.load %arg6[%c0_6, %c0_7] : memref<8x8xf32, #tpu.memory_space<vmem>>, vector<8x8xf32>
    %4 = vector.extract_strided_slice %1 {offsets = [0, 0], sizes = [8, 1], strides = [1, 1]} : vector<8x4xf32> to vector<8x1xf32>
    %5 = vector.extract_strided_slice %0 {offsets = [0, 0, 0], sizes = [2, 1, 256], strides = [1, 1, 1]} : vector<2x4x256xf32> to vector<2x1x256xf32>
    %6 = vector.shape_cast %4 : vector<8x1xf32> to vector<1x8x1xf32>
    %7 = vector.broadcast %6 : vector<1x8x1xf32> to vector<2x8x256xf32>
    %8 = vector.broadcast %5 : vector<2x1x256xf32> to vector<2x8x256xf32>
    %9 = arith.mulf %7, %8 : vector<2x8x256xf32>
    %10 = vector.extract_strided_slice %1 {offsets = [0, 1], sizes = [8, 1], strides = [1, 1]} : vector<8x4xf32> to vector<8x1xf32>
    %11 = vector.extract_strided_slice %0 {offsets = [0, 1, 0], sizes = [2, 1, 256], strides = [1, 1, 1]} : vector<2x4x256xf32> to vector<2x1x256xf32>
    %12 = vector.shape_cast %10 : vector<8x1xf32> to vector<1x8x1xf32>
    %13 = vector.broadcast %12 : vector<1x8x1xf32> to vector<2x8x256xf32>
    %14 = vector.broadcast %11 : vector<2x1x256xf32> to vector<2x8x256xf32>
    %15 = arith.mulf %13, %14 : vector<2x8x256xf32>
    %16 = arith.addf %9, %15 : vector<2x8x256xf32>
    %17 = vector.extract_strided_slice %1 {offsets = [0, 2], sizes = [8, 1], strides = [1, 1]} : vector<8x4xf32> to vector<8x1xf32>
    %18 = vector.extract_strided_slice %0 {offsets = [0, 2, 0], sizes = [2, 1, 256], strides = [1, 1, 1]} : vector<2x4x256xf32> to vector<2x1x256xf32>
    %19 = vector.shape_cast %17 : vector<8x1xf32> to vector<1x8x1xf32>
    %20 = vector.broadcast %19 : vector<1x8x1xf32> to vector<2x8x256xf32>
    %21 = vector.broadcast %18 : vector<2x1x256xf32> to vector<2x8x256xf32>
    %22 = arith.mulf %20, %21 : vector<2x8x256xf32>
    %23 = arith.addf %16, %22 : vector<2x8x256xf32>
    %24 = vector.extract_strided_slice %1 {offsets = [0, 3], sizes = [8, 1], strides = [1, 1]} : vector<8x4xf32> to vector<8x1xf32>
    %25 = vector.extract_strided_slice %0 {offsets = [0, 3, 0], sizes = [2, 1, 256], strides = [1, 1, 1]} : vector<2x4x256xf32> to vector<2x1x256xf32>
    %26 = vector.shape_cast %24 : vector<8x1xf32> to vector<1x8x1xf32>
    %27 = vector.broadcast %26 : vector<1x8x1xf32> to vector<2x8x256xf32>
    %28 = vector.broadcast %25 : vector<2x1x256xf32> to vector<2x8x256xf32>
    %29 = arith.mulf %27, %28 : vector<2x8x256xf32>
    %30 = arith.addf %23, %29 : vector<2x8x256xf32>
    %c0_8 = arith.constant 0 : index
    %c0_9 = arith.constant 0 : index
    %31 = vector.load %arg3[%c0_8, %c0_9] : memref<8x1xf32, #tpu.memory_space<vmem>>, vector<8x1xf32>
    %32 = vector.shape_cast %31 : vector<8x1xf32> to vector<1x8x1xf32>
    %33 = vector.broadcast %32 : vector<1x8x1xf32> to vector<2x8x256xf32>
    %34 = arith.addf %30, %33 : vector<2x8x256xf32>
    %cst = arith.constant 0.000000e+00 : f32
    %cst_10 = arith.constant 6.000000e+00 : f32
    %35 = vector.broadcast %cst : f32 to vector<2x8x256xf32>
    %36 = arith.maximumf %35, %34 : vector<2x8x256xf32>
    %37 = vector.broadcast %cst_10 : f32 to vector<2x8x256xf32>
    %38 = arith.minimumf %37, %36 : vector<2x8x256xf32>
    %39 = tpu.iota {dimensions = array<i32: 1>} : vector<1x256xi32>
    %c15_i32 = arith.constant 15 : i32
    %40 = vector.broadcast %c15_i32 : i32 to vector<1x256xi32>
    %41 = arith.andi %39, %40 : vector<1x256xi32>
    %c16_i32 = arith.constant 16 : i32
    %42 = vector.broadcast %c16_i32 : i32 to vector<1x256xi32>
    %43 = arith.cmpi sge, %39, %42 : vector<1x256xi32>
    %c240_i32 = arith.constant 240 : i32
    %44 = vector.broadcast %c240_i32 : i32 to vector<1x256xi32>
    %45 = arith.cmpi slt, %39, %44 : vector<1x256xi32>
    %c1_i32 = arith.constant 1 : i32
    %46 = vector.broadcast %c1_i32 : i32 to vector<1x256xi32>
    %47 = arith.cmpi sge, %41, %46 : vector<1x256xi32>
    %c14_i32 = arith.constant 14 : i32
    %48 = vector.broadcast %c14_i32 : i32 to vector<1x256xi32>
    %49 = arith.cmpi sle, %41, %48 : vector<1x256xi32>
    %50 = vector.extract_strided_slice %38 {offsets = [0, 0, 0], sizes = [1, 8, 256], strides = [1, 1, 1]} : vector<2x8x256xf32> to vector<1x8x256xf32>
    %51 = vector.shape_cast %50 : vector<1x8x256xf32> to vector<8x256xf32>
    %c17_i32 = arith.constant 17 : i32
    %52 = tpu.dynamic_rotate %51 by %c17_i32 dim 1 : vector<8x256xf32>, i32 -> vector<8x256xf32>
    %53 = arith.andi %43, %47 : vector<1x256xi1>
    %cst_11 = arith.constant 0.000000e+00 : f32
    %54 = vector.shape_cast %53 : vector<1x256xi1> to vector<1x256xi1>
    %55 = vector.broadcast %54 : vector<1x256xi1> to vector<8x256xi1>
    %56 = vector.broadcast %cst_11 : f32 to vector<8x256xf32>
    %57 = arith.select %55, %52, %56 : vector<8x256xi1>, vector<8x256xf32>
    %58 = vector.extract_strided_slice %2 {offsets = [0, 0], sizes = [8, 1], strides = [1, 1]} : vector<8x9xf32> to vector<8x1xf32>
    %59 = vector.broadcast %58 : vector<8x1xf32> to vector<8x256xf32>
    %60 = arith.mulf %57, %59 : vector<8x256xf32>
    %c16_i32_12 = arith.constant 16 : i32
    %61 = tpu.dynamic_rotate %51 by %c16_i32_12 dim 1 : vector<8x256xf32>, i32 -> vector<8x256xf32>
    %cst_13 = arith.constant 0.000000e+00 : f32
    %62 = vector.shape_cast %43 : vector<1x256xi1> to vector<1x256xi1>
    %63 = vector.broadcast %62 : vector<1x256xi1> to vector<8x256xi1>
    %64 = vector.broadcast %cst_13 : f32 to vector<8x256xf32>
    %65 = arith.select %63, %61, %64 : vector<8x256xi1>, vector<8x256xf32>
    %66 = vector.extract_strided_slice %2 {offsets = [0, 1], sizes = [8, 1], strides = [1, 1]} : vector<8x9xf32> to vector<8x1xf32>
    %67 = vector.broadcast %66 : vector<8x1xf32> to vector<8x256xf32>
    %68 = arith.mulf %65, %67 : vector<8x256xf32>
    %69 = arith.addf %60, %68 : vector<8x256xf32>
    %c15_i32_14 = arith.constant 15 : i32
    %70 = tpu.dynamic_rotate %51 by %c15_i32_14 dim 1 : vector<8x256xf32>, i32 -> vector<8x256xf32>
    %71 = arith.andi %43, %49 : vector<1x256xi1>
    %cst_15 = arith.constant 0.000000e+00 : f32
    %72 = vector.shape_cast %71 : vector<1x256xi1> to vector<1x256xi1>
    %73 = vector.broadcast %72 : vector<1x256xi1> to vector<8x256xi1>
    %74 = vector.broadcast %cst_15 : f32 to vector<8x256xf32>
    %75 = arith.select %73, %70, %74 : vector<8x256xi1>, vector<8x256xf32>
    %76 = vector.extract_strided_slice %2 {offsets = [0, 2], sizes = [8, 1], strides = [1, 1]} : vector<8x9xf32> to vector<8x1xf32>
    %77 = vector.broadcast %76 : vector<8x1xf32> to vector<8x256xf32>
    %78 = arith.mulf %75, %77 : vector<8x256xf32>
    %79 = arith.addf %69, %78 : vector<8x256xf32>
    %c1_i32_16 = arith.constant 1 : i32
    %80 = tpu.dynamic_rotate %51 by %c1_i32_16 dim 1 : vector<8x256xf32>, i32 -> vector<8x256xf32>
    %cst_17 = arith.constant 0.000000e+00 : f32
    %81 = vector.shape_cast %47 : vector<1x256xi1> to vector<1x256xi1>
    %82 = vector.broadcast %81 : vector<1x256xi1> to vector<8x256xi1>
    %83 = vector.broadcast %cst_17 : f32 to vector<8x256xf32>
    %84 = arith.select %82, %80, %83 : vector<8x256xi1>, vector<8x256xf32>
    %85 = vector.extract_strided_slice %2 {offsets = [0, 3], sizes = [8, 1], strides = [1, 1]} : vector<8x9xf32> to vector<8x1xf32>
    %86 = vector.broadcast %85 : vector<8x1xf32> to vector<8x256xf32>
    %87 = arith.mulf %84, %86 : vector<8x256xf32>
    %88 = arith.addf %79, %87 : vector<8x256xf32>
    %89 = vector.extract_strided_slice %2 {offsets = [0, 4], sizes = [8, 1], strides = [1, 1]} : vector<8x9xf32> to vector<8x1xf32>
    %90 = vector.broadcast %89 : vector<8x1xf32> to vector<8x256xf32>
    %91 = arith.mulf %51, %90 : vector<8x256xf32>
    %92 = arith.addf %88, %91 : vector<8x256xf32>
    %c255_i32 = arith.constant 255 : i32
    %93 = tpu.dynamic_rotate %51 by %c255_i32 dim 1 : vector<8x256xf32>, i32 -> vector<8x256xf32>
    %cst_18 = arith.constant 0.000000e+00 : f32
    %94 = vector.shape_cast %49 : vector<1x256xi1> to vector<1x256xi1>
    %95 = vector.broadcast %94 : vector<1x256xi1> to vector<8x256xi1>
    %96 = vector.broadcast %cst_18 : f32 to vector<8x256xf32>
    %97 = arith.select %95, %93, %96 : vector<8x256xi1>, vector<8x256xf32>
    %98 = vector.extract_strided_slice %2 {offsets = [0, 5], sizes = [8, 1], strides = [1, 1]} : vector<8x9xf32> to vector<8x1xf32>
    %99 = vector.broadcast %98 : vector<8x1xf32> to vector<8x256xf32>
    %100 = arith.mulf %97, %99 : vector<8x256xf32>
    %101 = arith.addf %92, %100 : vector<8x256xf32>
    %c241_i32 = arith.constant 241 : i32
    %102 = tpu.dynamic_rotate %51 by %c241_i32 dim 1 : vector<8x256xf32>, i32 -> vector<8x256xf32>
    %103 = arith.andi %45, %47 : vector<1x256xi1>
    %cst_19 = arith.constant 0.000000e+00 : f32
    %104 = vector.shape_cast %103 : vector<1x256xi1> to vector<1x256xi1>
    %105 = vector.broadcast %104 : vector<1x256xi1> to vector<8x256xi1>
    %106 = vector.broadcast %cst_19 : f32 to vector<8x256xf32>
    %107 = arith.select %105, %102, %106 : vector<8x256xi1>, vector<8x256xf32>
    %108 = vector.extract_strided_slice %2 {offsets = [0, 6], sizes = [8, 1], strides = [1, 1]} : vector<8x9xf32> to vector<8x1xf32>
    %109 = vector.broadcast %108 : vector<8x1xf32> to vector<8x256xf32>
    %110 = arith.mulf %107, %109 : vector<8x256xf32>
    %111 = arith.addf %101, %110 : vector<8x256xf32>
    %c240_i32_20 = arith.constant 240 : i32
    %112 = tpu.dynamic_rotate %51 by %c240_i32_20 dim 1 : vector<8x256xf32>, i32 -> vector<8x256xf32>
    %cst_21 = arith.constant 0.000000e+00 : f32
    %113 = vector.shape_cast %45 : vector<1x256xi1> to vector<1x256xi1>
    %114 = vector.broadcast %113 : vector<1x256xi1> to vector<8x256xi1>
    %115 = vector.broadcast %cst_21 : f32 to vector<8x256xf32>
    %116 = arith.select %114, %112, %115 : vector<8x256xi1>, vector<8x256xf32>
    %117 = vector.extract_strided_slice %2 {offsets = [0, 7], sizes = [8, 1], strides = [1, 1]} : vector<8x9xf32> to vector<8x1xf32>
    %118 = vector.broadcast %117 : vector<8x1xf32> to vector<8x256xf32>
    %119 = arith.mulf %116, %118 : vector<8x256xf32>
    %120 = arith.addf %111, %119 : vector<8x256xf32>
    %c239_i32 = arith.constant 239 : i32
    %121 = tpu.dynamic_rotate %51 by %c239_i32 dim 1 : vector<8x256xf32>, i32 -> vector<8x256xf32>
    %122 = arith.andi %45, %49 : vector<1x256xi1>
    %cst_22 = arith.constant 0.000000e+00 : f32
    %123 = vector.shape_cast %122 : vector<1x256xi1> to vector<1x256xi1>
    %124 = vector.broadcast %123 : vector<1x256xi1> to vector<8x256xi1>
    %125 = vector.broadcast %cst_22 : f32 to vector<8x256xf32>
    %126 = arith.select %124, %121, %125 : vector<8x256xi1>, vector<8x256xf32>
    %127 = vector.extract_strided_slice %2 {offsets = [0, 8], sizes = [8, 1], strides = [1, 1]} : vector<8x9xf32> to vector<8x1xf32>
    %128 = vector.broadcast %127 : vector<8x1xf32> to vector<8x256xf32>
    %129 = arith.mulf %126, %128 : vector<8x256xf32>
    %130 = arith.addf %120, %129 : vector<8x256xf32>
    %131 = vector.extract_strided_slice %38 {offsets = [1, 0, 0], sizes = [1, 8, 256], strides = [1, 1, 1]} : vector<2x8x256xf32> to vector<1x8x256xf32>
    %132 = vector.shape_cast %131 : vector<1x8x256xf32> to vector<8x256xf32>
    %c17_i32_23 = arith.constant 17 : i32
    %133 = tpu.dynamic_rotate %132 by %c17_i32_23 dim 1 : vector<8x256xf32>, i32 -> vector<8x256xf32>
    %134 = arith.andi %43, %47 : vector<1x256xi1>
    %cst_24 = arith.constant 0.000000e+00 : f32
    %135 = vector.shape_cast %134 : vector<1x256xi1> to vector<1x256xi1>
    %136 = vector.broadcast %135 : vector<1x256xi1> to vector<8x256xi1>
    %137 = vector.broadcast %cst_24 : f32 to vector<8x256xf32>
    %138 = arith.select %136, %133, %137 : vector<8x256xi1>, vector<8x256xf32>
    %139 = vector.extract_strided_slice %2 {offsets = [0, 0], sizes = [8, 1], strides = [1, 1]} : vector<8x9xf32> to vector<8x1xf32>
    %140 = vector.broadcast %139 : vector<8x1xf32> to vector<8x256xf32>
    %141 = arith.mulf %138, %140 : vector<8x256xf32>
    %c16_i32_25 = arith.constant 16 : i32
    %142 = tpu.dynamic_rotate %132 by %c16_i32_25 dim 1 : vector<8x256xf32>, i32 -> vector<8x256xf32>
    %cst_26 = arith.constant 0.000000e+00 : f32
    %143 = vector.shape_cast %43 : vector<1x256xi1> to vector<1x256xi1>
    %144 = vector.broadcast %143 : vector<1x256xi1> to vector<8x256xi1>
    %145 = vector.broadcast %cst_26 : f32 to vector<8x256xf32>
    %146 = arith.select %144, %142, %145 : vector<8x256xi1>, vector<8x256xf32>
    %147 = vector.extract_strided_slice %2 {offsets = [0, 1], sizes = [8, 1], strides = [1, 1]} : vector<8x9xf32> to vector<8x1xf32>
    %148 = vector.broadcast %147 : vector<8x1xf32> to vector<8x256xf32>
    %149 = arith.mulf %146, %148 : vector<8x256xf32>
    %150 = arith.addf %141, %149 : vector<8x256xf32>
    %c15_i32_27 = arith.constant 15 : i32
    %151 = tpu.dynamic_rotate %132 by %c15_i32_27 dim 1 : vector<8x256xf32>, i32 -> vector<8x256xf32>
    %152 = arith.andi %43, %49 : vector<1x256xi1>
    %cst_28 = arith.constant 0.000000e+00 : f32
    %153 = vector.shape_cast %152 : vector<1x256xi1> to vector<1x256xi1>
    %154 = vector.broadcast %153 : vector<1x256xi1> to vector<8x256xi1>
    %155 = vector.broadcast %cst_28 : f32 to vector<8x256xf32>
    %156 = arith.select %154, %151, %155 : vector<8x256xi1>, vector<8x256xf32>
    %157 = vector.extract_strided_slice %2 {offsets = [0, 2], sizes = [8, 1], strides = [1, 1]} : vector<8x9xf32> to vector<8x1xf32>
    %158 = vector.broadcast %157 : vector<8x1xf32> to vector<8x256xf32>
    %159 = arith.mulf %156, %158 : vector<8x256xf32>
    %160 = arith.addf %150, %159 : vector<8x256xf32>
    %c1_i32_29 = arith.constant 1 : i32
    %161 = tpu.dynamic_rotate %132 by %c1_i32_29 dim 1 : vector<8x256xf32>, i32 -> vector<8x256xf32>
    %cst_30 = arith.constant 0.000000e+00 : f32
    %162 = vector.shape_cast %47 : vector<1x256xi1> to vector<1x256xi1>
    %163 = vector.broadcast %162 : vector<1x256xi1> to vector<8x256xi1>
    %164 = vector.broadcast %cst_30 : f32 to vector<8x256xf32>
    %165 = arith.select %163, %161, %164 : vector<8x256xi1>, vector<8x256xf32>
    %166 = vector.extract_strided_slice %2 {offsets = [0, 3], sizes = [8, 1], strides = [1, 1]} : vector<8x9xf32> to vector<8x1xf32>
    %167 = vector.broadcast %166 : vector<8x1xf32> to vector<8x256xf32>
    %168 = arith.mulf %165, %167 : vector<8x256xf32>
    %169 = arith.addf %160, %168 : vector<8x256xf32>
    %170 = vector.extract_strided_slice %2 {offsets = [0, 4], sizes = [8, 1], strides = [1, 1]} : vector<8x9xf32> to vector<8x1xf32>
    %171 = vector.broadcast %170 : vector<8x1xf32> to vector<8x256xf32>
    %172 = arith.mulf %132, %171 : vector<8x256xf32>
    %173 = arith.addf %169, %172 : vector<8x256xf32>
    %c255_i32_31 = arith.constant 255 : i32
    %174 = tpu.dynamic_rotate %132 by %c255_i32_31 dim 1 : vector<8x256xf32>, i32 -> vector<8x256xf32>
    %cst_32 = arith.constant 0.000000e+00 : f32
    %175 = vector.shape_cast %49 : vector<1x256xi1> to vector<1x256xi1>
    %176 = vector.broadcast %175 : vector<1x256xi1> to vector<8x256xi1>
    %177 = vector.broadcast %cst_32 : f32 to vector<8x256xf32>
    %178 = arith.select %176, %174, %177 : vector<8x256xi1>, vector<8x256xf32>
    %179 = vector.extract_strided_slice %2 {offsets = [0, 5], sizes = [8, 1], strides = [1, 1]} : vector<8x9xf32> to vector<8x1xf32>
    %180 = vector.broadcast %179 : vector<8x1xf32> to vector<8x256xf32>
    %181 = arith.mulf %178, %180 : vector<8x256xf32>
    %182 = arith.addf %173, %181 : vector<8x256xf32>
    %c241_i32_33 = arith.constant 241 : i32
    %183 = tpu.dynamic_rotate %132 by %c241_i32_33 dim 1 : vector<8x256xf32>, i32 -> vector<8x256xf32>
    %184 = arith.andi %45, %47 : vector<1x256xi1>
    %cst_34 = arith.constant 0.000000e+00 : f32
    %185 = vector.shape_cast %184 : vector<1x256xi1> to vector<1x256xi1>
    %186 = vector.broadcast %185 : vector<1x256xi1> to vector<8x256xi1>
    %187 = vector.broadcast %cst_34 : f32 to vector<8x256xf32>
    %188 = arith.select %186, %183, %187 : vector<8x256xi1>, vector<8x256xf32>
    %189 = vector.extract_strided_slice %2 {offsets = [0, 6], sizes = [8, 1], strides = [1, 1]} : vector<8x9xf32> to vector<8x1xf32>
    %190 = vector.broadcast %189 : vector<8x1xf32> to vector<8x256xf32>
    %191 = arith.mulf %188, %190 : vector<8x256xf32>
    %192 = arith.addf %182, %191 : vector<8x256xf32>
    %c240_i32_35 = arith.constant 240 : i32
    %193 = tpu.dynamic_rotate %132 by %c240_i32_35 dim 1 : vector<8x256xf32>, i32 -> vector<8x256xf32>
    %cst_36 = arith.constant 0.000000e+00 : f32
    %194 = vector.shape_cast %45 : vector<1x256xi1> to vector<1x256xi1>
    %195 = vector.broadcast %194 : vector<1x256xi1> to vector<8x256xi1>
    %196 = vector.broadcast %cst_36 : f32 to vector<8x256xf32>
    %197 = arith.select %195, %193, %196 : vector<8x256xi1>, vector<8x256xf32>
    %198 = vector.extract_strided_slice %2 {offsets = [0, 7], sizes = [8, 1], strides = [1, 1]} : vector<8x9xf32> to vector<8x1xf32>
    %199 = vector.broadcast %198 : vector<8x1xf32> to vector<8x256xf32>
    %200 = arith.mulf %197, %199 : vector<8x256xf32>
    %201 = arith.addf %192, %200 : vector<8x256xf32>
    %c239_i32_37 = arith.constant 239 : i32
    %202 = tpu.dynamic_rotate %132 by %c239_i32_37 dim 1 : vector<8x256xf32>, i32 -> vector<8x256xf32>
    %203 = arith.andi %45, %49 : vector<1x256xi1>
    %cst_38 = arith.constant 0.000000e+00 : f32
    %204 = vector.shape_cast %203 : vector<1x256xi1> to vector<1x256xi1>
    %205 = vector.broadcast %204 : vector<1x256xi1> to vector<8x256xi1>
    %206 = vector.broadcast %cst_38 : f32 to vector<8x256xf32>
    %207 = arith.select %205, %202, %206 : vector<8x256xi1>, vector<8x256xf32>
    %208 = vector.extract_strided_slice %2 {offsets = [0, 8], sizes = [8, 1], strides = [1, 1]} : vector<8x9xf32> to vector<8x1xf32>
    %209 = vector.broadcast %208 : vector<8x1xf32> to vector<8x256xf32>
    %210 = arith.mulf %207, %209 : vector<8x256xf32>
    %211 = arith.addf %201, %210 : vector<8x256xf32>
    %212 = vector.shape_cast %130 : vector<8x256xf32> to vector<1x8x256xf32>
    %213 = vector.shape_cast %211 : vector<8x256xf32> to vector<1x8x256xf32>
    %214 = tpu.concatenate %212, %213 in 0 : vector<1x8x256xf32>, vector<1x8x256xf32> -> vector<2x8x256xf32>
    %c0_39 = arith.constant 0 : index
    %c0_40 = arith.constant 0 : index
    %215 = vector.load %arg5[%c0_39, %c0_40] : memref<8x1xf32, #tpu.memory_space<vmem>>, vector<8x1xf32>
    %216 = vector.shape_cast %215 : vector<8x1xf32> to vector<1x8x1xf32>
    %217 = vector.broadcast %216 : vector<1x8x1xf32> to vector<2x8x256xf32>
    %218 = arith.addf %214, %217 : vector<2x8x256xf32>
    %cst_41 = arith.constant 0.000000e+00 : f32
    %cst_42 = arith.constant 6.000000e+00 : f32
    %219 = vector.broadcast %cst_41 : f32 to vector<2x8x256xf32>
    %220 = arith.maximumf %219, %218 : vector<2x8x256xf32>
    %221 = vector.broadcast %cst_42 : f32 to vector<2x8x256xf32>
    %222 = arith.minimumf %221, %220 : vector<2x8x256xf32>
    %223 = vector.extract_strided_slice %3 {offsets = [0, 0], sizes = [8, 1], strides = [1, 1]} : vector<8x8xf32> to vector<8x1xf32>
    %224 = vector.extract_strided_slice %222 {offsets = [0, 0, 0], sizes = [2, 1, 256], strides = [1, 1, 1]} : vector<2x8x256xf32> to vector<2x1x256xf32>
    %225 = vector.shape_cast %223 : vector<8x1xf32> to vector<1x8x1xf32>
    %226 = vector.broadcast %225 : vector<1x8x1xf32> to vector<2x8x256xf32>
    %227 = vector.broadcast %224 : vector<2x1x256xf32> to vector<2x8x256xf32>
    %228 = arith.mulf %226, %227 : vector<2x8x256xf32>
    %229 = vector.extract_strided_slice %3 {offsets = [0, 1], sizes = [8, 1], strides = [1, 1]} : vector<8x8xf32> to vector<8x1xf32>
    %230 = vector.extract_strided_slice %222 {offsets = [0, 1, 0], sizes = [2, 1, 256], strides = [1, 1, 1]} : vector<2x8x256xf32> to vector<2x1x256xf32>
    %231 = vector.shape_cast %229 : vector<8x1xf32> to vector<1x8x1xf32>
    %232 = vector.broadcast %231 : vector<1x8x1xf32> to vector<2x8x256xf32>
    %233 = vector.broadcast %230 : vector<2x1x256xf32> to vector<2x8x256xf32>
    %234 = arith.mulf %232, %233 : vector<2x8x256xf32>
    %235 = arith.addf %228, %234 : vector<2x8x256xf32>
    %236 = vector.extract_strided_slice %3 {offsets = [0, 2], sizes = [8, 1], strides = [1, 1]} : vector<8x8xf32> to vector<8x1xf32>
    %237 = vector.extract_strided_slice %222 {offsets = [0, 2, 0], sizes = [2, 1, 256], strides = [1, 1, 1]} : vector<2x8x256xf32> to vector<2x1x256xf32>
    %238 = vector.shape_cast %236 : vector<8x1xf32> to vector<1x8x1xf32>
    %239 = vector.broadcast %238 : vector<1x8x1xf32> to vector<2x8x256xf32>
    %240 = vector.broadcast %237 : vector<2x1x256xf32> to vector<2x8x256xf32>
    %241 = arith.mulf %239, %240 : vector<2x8x256xf32>
    %242 = arith.addf %235, %241 : vector<2x8x256xf32>
    %243 = vector.extract_strided_slice %3 {offsets = [0, 3], sizes = [8, 1], strides = [1, 1]} : vector<8x8xf32> to vector<8x1xf32>
    %244 = vector.extract_strided_slice %222 {offsets = [0, 3, 0], sizes = [2, 1, 256], strides = [1, 1, 1]} : vector<2x8x256xf32> to vector<2x1x256xf32>
    %245 = vector.shape_cast %243 : vector<8x1xf32> to vector<1x8x1xf32>
    %246 = vector.broadcast %245 : vector<1x8x1xf32> to vector<2x8x256xf32>
    %247 = vector.broadcast %244 : vector<2x1x256xf32> to vector<2x8x256xf32>
    %248 = arith.mulf %246, %247 : vector<2x8x256xf32>
    %249 = arith.addf %242, %248 : vector<2x8x256xf32>
    %250 = vector.extract_strided_slice %3 {offsets = [0, 4], sizes = [8, 1], strides = [1, 1]} : vector<8x8xf32> to vector<8x1xf32>
    %251 = vector.extract_strided_slice %222 {offsets = [0, 4, 0], sizes = [2, 1, 256], strides = [1, 1, 1]} : vector<2x8x256xf32> to vector<2x1x256xf32>
    %252 = vector.shape_cast %250 : vector<8x1xf32> to vector<1x8x1xf32>
    %253 = vector.broadcast %252 : vector<1x8x1xf32> to vector<2x8x256xf32>
    %254 = vector.broadcast %251 : vector<2x1x256xf32> to vector<2x8x256xf32>
    %255 = arith.mulf %253, %254 : vector<2x8x256xf32>
    %256 = arith.addf %249, %255 : vector<2x8x256xf32>
    %257 = vector.extract_strided_slice %3 {offsets = [0, 5], sizes = [8, 1], strides = [1, 1]} : vector<8x8xf32> to vector<8x1xf32>
    %258 = vector.extract_strided_slice %222 {offsets = [0, 5, 0], sizes = [2, 1, 256], strides = [1, 1, 1]} : vector<2x8x256xf32> to vector<2x1x256xf32>
    %259 = vector.shape_cast %257 : vector<8x1xf32> to vector<1x8x1xf32>
    %260 = vector.broadcast %259 : vector<1x8x1xf32> to vector<2x8x256xf32>
    %261 = vector.broadcast %258 : vector<2x1x256xf32> to vector<2x8x256xf32>
    %262 = arith.mulf %260, %261 : vector<2x8x256xf32>
    %263 = arith.addf %256, %262 : vector<2x8x256xf32>
    %264 = vector.extract_strided_slice %3 {offsets = [0, 6], sizes = [8, 1], strides = [1, 1]} : vector<8x8xf32> to vector<8x1xf32>
    %265 = vector.extract_strided_slice %222 {offsets = [0, 6, 0], sizes = [2, 1, 256], strides = [1, 1, 1]} : vector<2x8x256xf32> to vector<2x1x256xf32>
    %266 = vector.shape_cast %264 : vector<8x1xf32> to vector<1x8x1xf32>
    %267 = vector.broadcast %266 : vector<1x8x1xf32> to vector<2x8x256xf32>
    %268 = vector.broadcast %265 : vector<2x1x256xf32> to vector<2x8x256xf32>
    %269 = arith.mulf %267, %268 : vector<2x8x256xf32>
    %270 = arith.addf %263, %269 : vector<2x8x256xf32>
    %271 = vector.extract_strided_slice %3 {offsets = [0, 7], sizes = [8, 1], strides = [1, 1]} : vector<8x8xf32> to vector<8x1xf32>
    %272 = vector.extract_strided_slice %222 {offsets = [0, 7, 0], sizes = [2, 1, 256], strides = [1, 1, 1]} : vector<2x8x256xf32> to vector<2x1x256xf32>
    %273 = vector.shape_cast %271 : vector<8x1xf32> to vector<1x8x1xf32>
    %274 = vector.broadcast %273 : vector<1x8x1xf32> to vector<2x8x256xf32>
    %275 = vector.broadcast %272 : vector<2x1x256xf32> to vector<2x8x256xf32>
    %276 = arith.mulf %274, %275 : vector<2x8x256xf32>
    %277 = arith.addf %270, %276 : vector<2x8x256xf32>
    %c0_43 = arith.constant 0 : index
    %c0_44 = arith.constant 0 : index
    %278 = vector.load %arg7[%c0_43, %c0_44] : memref<8x1xf32, #tpu.memory_space<vmem>>, vector<8x1xf32>
    %279 = vector.shape_cast %278 : vector<8x1xf32> to vector<1x8x1xf32>
    %280 = vector.broadcast %279 : vector<1x8x1xf32> to vector<2x8x256xf32>
    %281 = arith.addf %277, %280 : vector<2x8x256xf32>
    %c0_45 = arith.constant 0 : index
    %c0_46 = arith.constant 0 : index
    %c0_47 = arith.constant 0 : index
    %282 = vector.load %arg8[%c0_45, %c0_46, %c0_47] : memref<2x8x256xf32, #tpu.memory_space<vmem>>, vector<2x8x256xf32>
    tpu.vector_store %arg8[%c0_45, %c0_46, %c0_47], %281 {strides = array<i32>} : memref<2x8x256xf32, #tpu.memory_space<vmem>>, vector<2x8x256xf32>,
    %cst_48 = arith.constant dense<0.000000e+00> : vector<2x8xf32>
    %283 = vector.multi_reduction <add>, %281, %cst_48 [2] : vector<2x8x256xf32> to vector<2x8xf32>
    %284 = vector.shape_cast %283 : vector<2x8xf32> to vector<2x8x1xf32>
    %c0_49 = arith.constant 0 : index
    %c0_50 = arith.constant 0 : index
    %c0_51 = arith.constant 0 : index
    %285 = vector.load %arg9[%c0_49, %c0_50, %c0_51] : memref<2x8x2xf32, #tpu.memory_space<vmem>>, vector<2x8x1xf32>
    tpu.vector_store %arg9[%c0_49, %c0_50, %c0_51], %284 {strides = array<i32>} : memref<2x8x2xf32, #tpu.memory_space<vmem>>, vector<2x8x1xf32>,
    %286 = arith.mulf %281, %281 : vector<2x8x256xf32>
    %cst_52 = arith.constant dense<0.000000e+00> : vector<2x8xf32>
    %287 = vector.multi_reduction <add>, %286, %cst_52 [2] : vector<2x8x256xf32> to vector<2x8xf32>
    %288 = vector.shape_cast %287 : vector<2x8xf32> to vector<2x8x1xf32>
    %c0_53 = arith.constant 0 : index
    %c0_54 = arith.constant 0 : index
    %c1 = arith.constant 1 : index
    %289 = vector.load %arg9[%c0_53, %c0_54, %c1] : memref<2x8x2xf32, #tpu.memory_space<vmem>>, vector<2x8x1xf32>
    tpu.vector_store %arg9[%c0_53, %c0_54, %c1], %288 {strides = array<i32>} : memref<2x8x2xf32, #tpu.memory_space<vmem>>, vector<2x8x1xf32>,
    return
  }
  func.func @transform_0(%arg0: i32) -> (i32, i32, i32) {
    %c0_i32 = arith.constant 0 : i32
    %c0_i32_0 = arith.constant 0 : i32
    %c0_i32_1 = arith.constant 0 : i32
    return %arg0, %c0_i32, %c0_i32_0 : i32, i32, i32
  }
  func.func @transform_1(%arg0: i32) -> (i32, i32) {
    %c0_i32 = arith.constant 0 : i32
    %c0_i32_0 = arith.constant 0 : i32
    %c0_i32_1 = arith.constant 0 : i32
    return %c0_i32, %c0_i32_0 : i32, i32
  }
  func.func @transform_2(%arg0: i32) -> (i32, i32) {
    %c0_i32 = arith.constant 0 : i32
    %c0_i32_0 = arith.constant 0 : i32
    %c0_i32_1 = arith.constant 0 : i32
    return %c0_i32, %c0_i32_0 : i32, i32
  }
  func.func @transform_3(%arg0: i32) -> (i32, i32) {
    %c0_i32 = arith.constant 0 : i32
    %c0_i32_0 = arith.constant 0 : i32
    %c0_i32_1 = arith.constant 0 : i32
    return %c0_i32, %c0_i32_0 : i32, i32
  }
  func.func @transform_4(%arg0: i32) -> (i32, i32) {
    %c0_i32 = arith.constant 0 : i32
    %c0_i32_0 = arith.constant 0 : i32
    %c0_i32_1 = arith.constant 0 : i32
    return %c0_i32, %c0_i32_0 : i32, i32
  }
  func.func @transform_5(%arg0: i32) -> (i32, i32) {
    %c0_i32 = arith.constant 0 : i32
    %c0_i32_0 = arith.constant 0 : i32
    %c0_i32_1 = arith.constant 0 : i32
    return %c0_i32, %c0_i32_0 : i32, i32
  }
  func.func @transform_6(%arg0: i32) -> (i32, i32) {
    %c0_i32 = arith.constant 0 : i32
    %c0_i32_0 = arith.constant 0 : i32
    %c0_i32_1 = arith.constant 0 : i32
    return %c0_i32, %c0_i32_0 : i32, i32
  }
  func.func @transform_7(%arg0: i32) -> (i32, i32, i32) {
    %c0_i32 = arith.constant 0 : i32
    %c0_i32_0 = arith.constant 0 : i32
    %c0_i32_1 = arith.constant 0 : i32
    return %arg0, %c0_i32, %c0_i32_0 : i32, i32, i32
  }
  func.func @transform_8(%arg0: i32) -> (i32, i32, i32) {
    %c0_i32 = arith.constant 0 : i32
    %c0_i32_0 = arith.constant 0 : i32
    %c0_i32_1 = arith.constant 0 : i32
    return %arg0, %c0_i32, %c0_i32_0 : i32, i32, i32
  }
}

module attributes {stable_mosaic.version = 11 : i64} {
  func.func @_bn_apply_kernel(%arg0: i32, %arg1: memref<2x8x256xf32, #tpu.memory_space<vmem>>, %arg2: memref<8x1xf32, #tpu.memory_space<vmem>>, %arg3: memref<8x1xf32, #tpu.memory_space<vmem>>, %arg4: memref<2x8x256xf32, #tpu.memory_space<vmem>>) attributes {dimension_semantics = [#tpu.dimension_semantics<parallel>], iteration_bounds = array<i64: 1>, scalar_prefetch = 0 : i64, scratch_operands = 0 : i64, tpu.core_type = #tpu.core_type<tc>, window_params = [{transform_indices = @transform_0, window_bounds = array<i64: 2, 8, 256>}, {pipeline_mode = #tpu.pipeline_mode<synchronous>, transform_indices = @transform_1, window_bounds = array<i64: 8, 1>}, {pipeline_mode = #tpu.pipeline_mode<synchronous>, transform_indices = @transform_2, window_bounds = array<i64: 8, 1>}, {transform_indices = @transform_3, window_bounds = array<i64: 2, 8, 256>}]} {
    %c0 = arith.constant 0 : index
    %c0_0 = arith.constant 0 : index
    %c0_1 = arith.constant 0 : index
    %0 = vector.load %arg1[%c0, %c0_0, %c0_1] : memref<2x8x256xf32, #tpu.memory_space<vmem>>, vector<2x8x256xf32>
    %c0_2 = arith.constant 0 : index
    %c0_3 = arith.constant 0 : index
    %1 = vector.load %arg2[%c0_2, %c0_3] : memref<8x1xf32, #tpu.memory_space<vmem>>, vector<8x1xf32>
    %2 = vector.shape_cast %1 : vector<8x1xf32> to vector<1x8x1xf32>
    %3 = vector.broadcast %2 : vector<1x8x1xf32> to vector<2x8x256xf32>
    %4 = arith.mulf %0, %3 : vector<2x8x256xf32>
    %c0_4 = arith.constant 0 : index
    %c0_5 = arith.constant 0 : index
    %5 = vector.load %arg3[%c0_4, %c0_5] : memref<8x1xf32, #tpu.memory_space<vmem>>, vector<8x1xf32>
    %6 = vector.shape_cast %5 : vector<8x1xf32> to vector<1x8x1xf32>
    %7 = vector.broadcast %6 : vector<1x8x1xf32> to vector<2x8x256xf32>
    %8 = arith.addf %4, %7 : vector<2x8x256xf32>
    %c0_6 = arith.constant 0 : index
    %c0_7 = arith.constant 0 : index
    %c0_8 = arith.constant 0 : index
    %9 = vector.load %arg4[%c0_6, %c0_7, %c0_8] : memref<2x8x256xf32, #tpu.memory_space<vmem>>, vector<2x8x256xf32>
    tpu.vector_store %arg4[%c0_6, %c0_7, %c0_8], %8 {strides = array<i32>} : memref<2x8x256xf32, #tpu.memory_space<vmem>>, vector<2x8x256xf32>,
    return
  }
  func.func @transform_0(%arg0: i32) -> (i32, i32, i32) {
    %c0_i32 = arith.constant 0 : i32
    %c0_i32_0 = arith.constant 0 : i32
    %c0_i32_1 = arith.constant 0 : i32
    return %arg0, %c0_i32, %c0_i32_0 : i32, i32, i32
  }
  func.func @transform_1(%arg0: i32) -> (i32, i32) {
    %c0_i32 = arith.constant 0 : i32
    %c0_i32_0 = arith.constant 0 : i32
    %c0_i32_1 = arith.constant 0 : i32
    return %c0_i32, %c0_i32_0 : i32, i32
  }
  func.func @transform_2(%arg0: i32) -> (i32, i32) {
    %c0_i32 = arith.constant 0 : i32
    %c0_i32_0 = arith.constant 0 : i32
    %c0_i32_1 = arith.constant 0 : i32
    return %c0_i32, %c0_i32_0 : i32, i32
  }
  func.func @transform_3(%arg0: i32) -> (i32, i32, i32) {
    %c0_i32 = arith.constant 0 : i32
    %c0_i32_0 = arith.constant 0 : i32
    %c0_i32_1 = arith.constant 0 : i32
    return %arg0, %c0_i32, %c0_i32_0 : i32, i32, i32
  }
}

</mosaic_0001>

<bundles_post_ra>
// kernel: mbconv_pallas.3
= control target key start
LH: loop header
LB: loop body
LE: loop exit
PB: predicated region body
PF: predicated region fallthrough
CT: control target
= control target key end

     0   :  { %v48_v0 = vmov 0   ;;  %s99_s1 = inlined_call_operand.vmem [shape: f32[8,1], index: 1, kind: input, shape index: {}]   ;;  %s100_s2 = inlined_call_operand.vmem [shape: f32[8,1], index: 2, kind: input, shape index: {}]   ;;  %s101_s0 = inlined_call_operand.vmem [shape: f32[2,8,256], index: 0, kind: input, shape index: {}, may-alias: {0,3}]   ;;  %s102_s3 = inlined_call_operand.vmem [shape: f32[2,8,256], index: 3, kind: output, shape index: {}, may-alias: {0,3}]  }
   0x1   :  { %47 = vset.pattern.permute.xlu0 %v48_v0  ;;  %v18_v1 = vld [vmem:[%s99_s1] sm:$0xff]  ;;  %v15_v5 = vld [vmem:[%s101_s0 + $0x8] sm:$0xff]  ;;  %v16_v6 = vld [vmem:[%s101_s0 + $0x10] sm:$0xff] }
   0x2   :  { %21 = vperm.xlu0 %47, %v18_v1   ;;  %v28_v2 = vld [vmem:[%s100_s2] sm:$0xff]  ;;  %v17_v7 = vld [vmem:[%s101_s0 + $0x18] sm:$0xff] }
   0x3   :  { %v14_v3 = vld [vmem:[%s101_s0] sm:$0xff] }
   0x6   :  { %31 = vperm.xlu0 %47, %v28_v2  }
  0x81   :  { %v22_v4 = vpop.permute.xlu0 %21 }
  0x82   :  { %v24_v8 = vmul.f32 %v22_v4, %v14_v3  ;;  %v25_v9 = vmul.f32 %v22_v4, %v15_v5  ;;  %v26_v10 = vmul.f32 %v22_v4, %v16_v6  ;;  %v27_v11 = vmul.f32 %v22_v4, %v17_v7 }
  0x85   :  { %v32_v12 = vpop.permute.xlu0 %31 }
  0x86   :  { %v34_v13 = vadd.f32 %v32_v12, %v24_v8  ;;  %v35_v14 = vadd.f32 %v32_v12, %v25_v9  ;;  %v36_v15 = vadd.f32 %v32_v12, %v26_v10  ;;  %v37_v16 = vadd.f32 %v32_v12, %v27_v11 }
  0x88   :  { %38 = vst [vmem:[%s102_s3] sm:$0xff] %v34_v13  ;;  %39 = vst [vmem:[%s102_s3 + $0x8] sm:$0xff] %v35_v14 }
  0x89   :  { %40 = vst [vmem:[%s102_s3 + $0x10] sm:$0xff] %v36_v15  ;;  %41 = vst [vmem:[%s102_s3 + $0x18] sm:$0xff] %v37_v16 }

// kernel: mbconv_pallas.2
= control target key start
LH: loop header
LB: loop body
LE: loop exit
PB: predicated region body
PF: predicated region fallthrough
CT: control target
= control target key end

     0   :  { %v858_v0 = vmov 0   ;;  %v859_v2 = vmov 2   ;;  %v860_v3 = vmov 1   ;;  %v861_v4 = vmov 3   ;;  %s869_s14 = smov 15   ;;  %s870_s15 = smov 1   ;;  %s1466_s1 = inlined_call_operand.vmem [shape: f32[8,4], index: 1, kind: input, shape index: {}]   ;;  %s1467_s2 = inlined_call_operand.vmem [shape: f32[8,1], index: 2, kind: input, shape index: {}]   ;;  %s1468_s3 = inlined_call_operand.vmem [shape: f32[8,9], index: 3, kind: input, shape index: {}]   ;;  %s1469_s4 = inlined_call_operand.vmem [shape: f32[8,1], index: 4, kind: input, shape index: {}]   ;;  %s1470_s0 = inlined_call_operand.vmem [shape: f32[2,4,256], index: 0, kind: input, shape index: {}]   ;;  %s1471_s5 = inlined_call_operand.vmem [shape: f32[8,8], index: 5, kind: input, shape index: {}]   ;;  %s1472_s6 = inlined_call_operand.vmem [shape: f32[8,1], index: 6, kind: input, shape index: {}]   ;;  %s1473_s7 = inlined_call_operand.vmem [shape: f32[2,8,256], index: 7, kind: output, shape index: {0}]   ;;  %s1474_s8 = inlined_call_operand.vmem [shape: f32[2,8,2], index: 8, kind: output, shape index: {1}]  }
   0x1   :  { %836 = vset.pattern.permute.xlu0 %v858_v0  ;;  %v30_v1 = vld [vmem:[%s1466_s1] sm:$0xff]  ;;  %838 = vset.pattern.permute.xlu1 %v859_v2  ;;  %v862_v7 = vmov 4   ;;  %v863_v8 = vmov 5   ;;  %v864_v9 = vmov 6   ;;  %v865_v10 = vmov 7   ;;  %v956_v19 = vld [vmem:[%s1470_s0 + $0x8] sm:$0xff] }
   0x2   :  { %35 = vperm.xlu0 %836, %v30_v1   ;;  %129 = vperm.xlu1 %838, %v30_v1   ;;  %v224_v5 = vld [vmem:[%s1467_s2] sm:$0xff]  ;;  %v866_v11 = vmov 8   ;;  %v40_v13 = vlaneseq  ;;  %s871_s16 = smov 127   ;;  %s872_s17 = smov 113  }
   0x3   :  { %v31_v6 = vld [vmem:[%s1468_s3] sm:$0xff]  ;;  %s873_s18 = smov 112   ;;  %s874_s19 = smov 111  }
   0x4   :  { %v536_v12 = vld [vmem:[%s1469_s4] sm:$0xff]  ;;  %v41_v14 = vshrl.u32 %v40_v13, 7  ;;  %s868_s4 = smov 17  }
   0x5   :  { %v28_v18 = vld [vmem:[%s1470_s0] sm:$0xff]  ;;  %s867_s0 = smov 16  }
   0x6   :  { %837 = vset.pattern.permute.xlu0 %v860_v3  ;;  %839 = vset.pattern.permute.xlu1 %v861_v4  ;;  %v944_v15 = vsub.s32 0, %v41_v14  ;;  %v946_v16 = vsub.s32 4, %v41_v14  ;;  %v948_v17 = vsub.s32 2, %v41_v14  ;;  %v958_v20 = vsub.s32 6, %v41_v14 }
   0x7   :  { %81 = vperm.xlu0 %837, %v30_v1   ;;  %177 = vperm.xlu1 %839, %v30_v1   ;;  %v960_v21 = vsub.s32 1, %v41_v14  ;;  %v962_v22 = vsub.s32 5, %v41_v14  ;;  %v964_v23 = vsub.s32 3, %v41_v14  ;;  %v966_v24 = vsub.s32 7, %v41_v14 }
   0x8   :  { %v43_v25 = vrot.slane %v28_v18, %v944_v15  ;;  %v47_v26 = vrot.slane %v28_v18, %v946_v16  ;;  %v51_v27 = vrot.slane %v956_v19, %v944_v15  ;;  %v135_v28 = vrot.slane %v28_v18, %v948_v17 }
   0x9   :  { %v139_v29 = vrot.slane %v28_v18, %v958_v20  ;;  %v87_v30 = vrot.slane %v28_v18, %v960_v21  ;;  %v91_v31 = vrot.slane %v28_v18, %v962_v22  ;;  %v95_v32 = vrot.slane %v956_v19, %v960_v21 }
   0xa   :  { %v143_v33 = vrot.slane %v956_v19, %v948_v17  ;;  %v99_v34 = vrot.slane %v956_v19, %v962_v22  ;;  %v183_v35 = vrot.slane %v28_v18, %v964_v23  ;;  %v187_v36 = vrot.slane %v28_v18, %v966_v24 }
   0xb   :  { %840 = vset.pattern.permute.xlu1 %v858_v0  ;;  %843 = vset.pattern.permute.xlu0 %v861_v4  ;;  %v55_v38 = vrot.slane %v956_v19, %v946_v16  ;;  %v191_v40 = vrot.slane %v956_v19, %v964_v23  ;;  %v63_v41 = vrot.slane %v43_v25, %v944_v15 }
   0xc   :  { %227 = vperm.xlu1 %840, %v224_v5   ;;  %335 = vperm.xlu0 %843, %v31_v6   ;;  %v67_v42 = vrot.slane %v47_v26, %v944_v15  ;;  %v71_v43 = vrot.slane %v51_v27, %v944_v15  ;;  %v155_v44 = vrot.slane %v135_v28, %v948_v17 }
   0xd   :  { %v159_v45 = vrot.slane %v139_v29, %v948_v17  ;;  %v107_v46 = vrot.slane %v87_v30, %v960_v21  ;;  %v111_v47 = vrot.slane %v91_v31, %v960_v21  ;;  %v115_v48 = vrot.slane %v95_v32, %v960_v21 }
   0xe   :  { %v163_v49 = vrot.slane %v143_v33, %v948_v17  ;;  %v119_v50 = vrot.slane %v99_v34, %v960_v21  ;;  %v203_v51 = vrot.slane %v183_v35, %v964_v23  ;;  %v207_v52 = vrot.slane %v187_v36, %v964_v23 }
   0xf   :  { %v75_v53 = vrot.slane %v55_v38, %v944_v15  ;;  %v147_v54 = vrot.slane %v956_v19, %v958_v20  ;;  %v195_v55 = vrot.slane %v956_v19, %v966_v24  ;;  %v211_v56 = vrot.slane %v191_v40, %v964_v23 }
  0x10   :  { %844 = vset.pattern.permute.xlu0 %v862_v7  ;;  %841 = vset.pattern.permute.xlu1 %v860_v3 }
  0x11   :  { %343 = vperm.xlu0 %844, %v31_v6   ;;  %291 = vperm.xlu1 %841, %v31_v6   ;;  %v167_v28 = vrot.slane %v147_v54, %v948_v17  ;;  %v215_v33 = vrot.slane %v195_v55, %v964_v23  ;;  %v32_v54 = vld [vmem:[%s1471_s5] sm:$0xff] }
  0x12   :  { %v775_v55 = vld [vmem:[%s1472_s6] sm:$0xff] }
  0x15   :  { %845 = vset.pattern.permute.xlu0 %v863_v8  ;;  %842 = vset.pattern.permute.xlu1 %v859_v2 }
  0x16   :  { %364 = vperm.xlu0 %845, %v31_v6   ;;  %314 = vperm.xlu1 %842, %v31_v6  }
  0x1a   :  { %846 = vset.pattern.permute.xlu0 %v864_v9  ;;  %848 = vset.pattern.permute.xlu1 %v865_v10 }
  0x1b   :  { %387 = vperm.xlu0 %846, %v31_v6   ;;  %408 = vperm.xlu1 %848, %v31_v6  }
  0x1f   :  { %847 = vset.pattern.permute.xlu0 %v858_v0  ;;  %849 = vset.pattern.permute.xlu1 %v866_v11 }
  0x20   :  { %272 = vperm.xlu0 %847, %v31_v6   ;;  %431 = vperm.xlu1 %849, %v31_v6  }
  0x24   :  { %539 = vperm.xlu0 %847, %v536_v12   ;;  %850 = vset.pattern.permute.xlu1 %v860_v3 }
  0x81   :  { %v36_v37 = vpop.permute.xlu0 %35  ;;  %v130_v39 = vpop.permute.xlu1 %129 }
  0x82   :  { %v76_v57 = vmul.f32 %v63_v41, %v36_v37  ;;  %v77_v58 = vmul.f32 %v67_v42, %v36_v37  ;;  %v78_v59 = vmul.f32 %v71_v43, %v36_v37  ;;  %v168_v60 = vmul.f32 %v155_v44, %v130_v39 }
  0x83   :  { %v169_v63 = vmul.f32 %v159_v45, %v130_v39  ;;  %v170_v6 = vmul.f32 %v163_v49, %v130_v39  ;;  %v79_v27 = vmul.f32 %v75_v53, %v36_v37  ;;  %v171_v40 = vmul.f32 %v167_v28, %v130_v39 }
  0x86   :  { %v82_v61 = vpop.permute.xlu0 %81  ;;  %v178_v62 = vpop.permute.xlu1 %177 }
  0x87   :  { %v120_v1 = vmul.f32 %v107_v46, %v82_v61  ;;  %v121_v3 = vmul.f32 %v111_v47, %v82_v61  ;;  %v122_v5 = vmul.f32 %v115_v48, %v82_v61  ;;  %v123_v11 = vmul.f32 %v119_v50, %v82_v61 }
  0x88   :  { %v216_v12 = vmul.f32 %v203_v51, %v178_v62  ;;  %v217_v14 = vmul.f32 %v207_v52, %v178_v62  ;;  %v218_v19 = vmul.f32 %v211_v56, %v178_v62  ;;  %v219_v43 = vmul.f32 %v215_v33, %v178_v62 }
  0x89   :  { %v124_v18 = vadd.f32 %v120_v1, %v76_v57  ;;  %v125_v25 = vadd.f32 %v121_v3, %v77_v58  ;;  %v126_v26 = vadd.f32 %v122_v5, %v78_v59  ;;  %v127_v32 = vadd.f32 %v123_v11, %v79_v27 }
  0x8b   :  { %v172_v29 = vadd.f32 %v168_v60, %v124_v18  ;;  %v173_v30 = vadd.f32 %v169_v63, %v125_v25  ;;  %v174_v31 = vadd.f32 %v170_v6, %v126_v26  ;;  %v228_v34 = vpop.permute.xlu1 %227  ;;  %v175_v44 = vadd.f32 %v171_v40, %v127_v32 }
  0x8d   :  { %v220_v35 = vadd.f32 %v216_v12, %v172_v29  ;;  %v221_v36 = vadd.f32 %v217_v14, %v173_v30  ;;  %v222_v38 = vadd.f32 %v218_v19, %v174_v31  ;;  %v223_v48 = vadd.f32 %v219_v43, %v175_v44 }
  0x8e   :  { %v1096_v12 = vand.u32 127, %v40_v13 }
  0x8f   :  { %v230_v41 = vadd.f32 %v228_v34, %v220_v35  ;;  %v232_v42 = vadd.f32 %v228_v34, %v222_v38  ;;  %v231_v45 = vadd.f32 %v228_v34, %v221_v36  ;;  %v233_v39 = vadd.f32 %v228_v34, %v223_v48 }
  0x90   :  { %v245_v18 = vand.u32 15, %v1096_v12  ;;  %vm281_vm0 = vcmp.lt.s32.totalorder %v1096_v12, 16  ;;  %vm247_vm1 = vcmp.ge.s32.totalorder %v1096_v12, 16  ;;  %vm259_vm3 = vcmp.lt.s32.totalorder %v1096_v12, 17 }
  0x91   :  { %v234_v46 = vmax.f32 %v230_v41, 0.0  ;;  %v236_v37 = vmax.f32 %v232_v42, 0.0  ;;  %v235_v49 = vmax.f32 %v231_v45, 0.0  ;;  %v237_v52 = vmax.f32 %v233_v39, 0.0 }
  0x92   :  { %vm1103_vm2 = vcmp.ge.s32.totalorder %v245_v18, 1  ;;  %vm1112_vm4 = vcmp.le.s32.totalorder %v245_v18, 14  ;;  %vm302_vm5 = vcmp.lt.s32.totalorder %v1096_v12, 15  ;;  %vm325_vm8 = vcmp.lt.s32.totalorder %v1096_v12, 1 }
  0x93   :  { %v1008_v47 = vmin.f32 %v234_v46, 6.0  ;;  %v1012_v50 = vmin.f32 %v236_v37, 6.0  ;;  %v1014_v51 = vmin.f32 %v235_v49, 6.0  ;;  %v1020_v53 = vmin.f32 %v237_v52, 6.0  ;;  %vm1128_vm6 = vmand %vm247_vm1, %vm1103_vm2 }
  0x94   :  { %vm1140_vm7 = vmand %vm247_vm1, %vm1112_vm4  ;;  %v1155_v45 = vadd.s32 128, %v1096_v12  ;;  %vm354_vm9 = vcmp.lt.s32.totalorder %v1096_v12, 127  ;;  %vm375_vm13 = vcmp.lt.s32.totalorder %v1096_v12, 113  ;;  %vm398_vm14 = vcmp.lt.s32.totalorder %v1096_v12, 112 }
  0x95   :  { %277 = vrot.lane.b32.xlu0 %v1008_v47, %s867_s0  ;;  %255 = vrot.lane.b32.xlu1 %v1008_v47, %s868_s4 }
  0x96   :  { %vm250_vm12 = vcmp.lt.s32.totalorder %v1155_v45, 240 }
  0x99   :  { %438 = vrot.lane.b32.xlu0 %v1012_v50, %s868_s4  ;;  %257 = vrot.lane.b32.xlu1 %v1014_v51, %s868_s4 }
  0x9d   :  { %448 = vrot.lane.b32.xlu0 %v1012_v50, %s867_s0  ;;  %279 = vrot.lane.b32.xlu1 %v1014_v51, %s867_s0 }
  0xa1   :  { %460 = vrot.lane.b32.xlu0 %v1012_v50, %s869_s14  ;;  %440 = vrot.lane.b32.xlu1 %v1020_v53, %s868_s4 }
  0xa5   :  { %472 = vrot.lane.b32.xlu0 %v1012_v50, %s870_s15  ;;  %450 = vrot.lane.b32.xlu1 %v1020_v53, %s867_s0 }
  0xa9   :  { %352 = vrot.lane.b32.xlu0 %v1014_v51, %s871_s16  ;;  %298 = vrot.lane.b32.xlu1 %v1008_v47, %s869_s14 }
  0xad   :  { %490 = vrot.lane.b32.xlu0 %v1020_v53, %s871_s16  ;;  %300 = vrot.lane.b32.xlu1 %v1014_v51, %s869_s14 }
  0xb1   :  { %371 = vrot.lane.b32.xlu0 %v1008_v47, %s872_s17  ;;  %462 = vrot.lane.b32.xlu1 %v1020_v53, %s869_s14 }
  0xb5   :  { %500 = vrot.lane.b32.xlu0 %v1012_v50, %s872_s17  ;;  %321 = vrot.lane.b32.xlu1 %v1008_v47, %s870_s15 }
  0xb9   :  { %394 = vrot.lane.b32.xlu0 %v1008_v47, %s873_s18  ;;  %323 = vrot.lane.b32.xlu1 %v1014_v51, %s870_s15 }
  0xbd   :  { %512 = vrot.lane.b32.xlu0 %v1012_v50, %s873_s18  ;;  %474 = vrot.lane.b32.xlu1 %v1020_v53, %s870_s15 }
  0xc1   :  { %524 = vrot.lane.b32.xlu0 %v1012_v50, %s874_s19  ;;  %350 = vrot.lane.b32.xlu1 %v1008_v47, %s871_s16 }
  0xc5   :  { %556 = vperm.xlu0 %847, %v32_v54   ;;  %488 = vrot.lane.b32.xlu1 %v1012_v50, %s871_s16 }
  0xc9   :  { %851 = vset.pattern.permute.xlu0 %v859_v2  ;;  %373 = vrot.lane.b32.xlu1 %v1014_v51, %s872_s17  ;;  %v1057_v2 = vpop.permute.xlu0 %335 }
  0xca   :  { %608 = vperm.xlu0 %851, %v32_v54  }
  0xcd   :  { %502 = vrot.lane.b32.xlu1 %v1020_v53, %s872_s17 }
  0xce   :  { %854 = vset.pattern.permute.xlu0 %v863_v8  ;;  %v1061_v8 = vpop.permute.xlu0 %343 }
  0xcf   :  { %692 = vperm.xlu0 %854, %v32_v54  }
  0xd1   :  { %396 = vrot.lane.b32.xlu1 %v1014_v51, %s873_s18 }
  0xd2   :  { %v1066_v56 = vpop.permute.xlu0 %364 }
  0xd3   :  { %857 = vset.pattern.permute.xlu0 %v858_v0  ;;  %v1063_v0 = vpop.permute.xlu1 %291 }
  0xd4   :  { %778 = vperm.xlu0 %857, %v775_v55   ;;  %v246_v55 = vand.u32 15, %v1155_v45 }
  0xd5   :  { %514 = vrot.lane.b32.xlu1 %v1020_v53, %s873_s18 }
  0xd6   :  { %v1071_v58 = vpop.permute.xlu0 %387  ;;  %vm1175_vm10 = vcmp.ge.s32.totalorder %v246_v55, 1  ;;  %vm1197_vm11 = vcmp.le.s32.totalorder %v246_v55, 14 }
  0xd7   :  { %v1068_v57 = vpop.permute.xlu1 %314  ;;  %vm1283_vm15 = vmand %vm250_vm12, %vm1175_vm10 }
  0xd9   :  { %415 = vrot.lane.b32.xlu1 %v1008_v47, %s874_s19 }
  0xdd   :  { %417 = vrot.lane.b32.xlu1 %v1014_v51, %s874_s19 }
  0xe1   :  { %526 = vrot.lane.b32.xlu1 %v1020_v53, %s874_s19 }
  0xe5   :  { %580 = vperm.xlu1 %850, %v32_v54  }
  0xe9   :  { %852 = vset.pattern.permute.xlu1 %v861_v4  ;;  %v1073_v4 = vpop.permute.xlu1 %408 }
  0xea   :  { %636 = vperm.xlu1 %852, %v32_v54  }
  0xed   :  { %v1077_v59 = vpop.permute.xlu1 %431 }
  0xee   :  { %853 = vset.pattern.permute.xlu1 %v862_v7  ;;  %v1075_v7 = vpop.permute.xlu0 %272 }
  0xef   :  { %664 = vperm.xlu1 %853, %v32_v54  }
  0xf2   :  { %v1079_v60 = vpop.permute.xlu0 %539 }
  0xf3   :  { %855 = vset.pattern.permute.xlu1 %v864_v9 }
  0xf4   :  { %720 = vperm.xlu1 %855, %v32_v54  }
  0xf8   :  { %856 = vset.pattern.permute.xlu1 %v865_v10 }
  0xf9   :  { %748 = vperm.xlu1 %856, %v32_v54   ;;  %v484_v54 = vmul.f32 %v1061_v8, %v1012_v50 }
 0x107   :  { %v256_v61 = vpop.permute.xlu1 %255  ;;  %v1081_v9 = vpop.permute.xlu0 %277 }
 0x10b   :  { %v258_v62 = vpop.permute.xlu1 %257  ;;  %v1085_v1 = vpop.permute.xlu0 %438 }
 0x10c   :  { %v260_v50 = vsel %vm259_vm3, %v256_v61, %v258_v62 }
 0x10f   :  { %v1083_v63 = vpop.permute.xlu1 %279  ;;  %v1089_v3 = vpop.permute.xlu0 %448 }
 0x113   :  { %v1087_v10 = vpop.permute.xlu1 %440  ;;  %v1093_v11 = vpop.permute.xlu0 %460 }
 0x114   :  { %v443_v29 = vsel %vm259_vm3, %v1087_v10, %v1085_v1  ;;  %v442_v55 = vsel %vm259_vm3, %v1085_v1, %v1087_v10 }
 0x115   :  { %v444_v35 = vsel %vm1128_vm6, %v443_v29, 0.0 }
 0x116   :  { %v446_v41 = vmul.f32 %v444_v35, %v1075_v7 }
 0x117   :  { %v1091_v5 = vpop.permute.xlu1 %450  ;;  %v1099_v25 = vpop.permute.xlu0 %472 }
 0x118   :  { %v453_v13 = vsel %vm281_vm0, %v1091_v5, %v1089_v3 }
 0x119   :  { %v454_v32 = vsel %vm247_vm1, %v453_v13, 0.0 }
 0x11a   :  { %v456_v40 = vmul.f32 %v454_v32, %v1063_v0 }
 0x11b   :  { %v299_v6 = vpop.permute.xlu1 %298  ;;  %v1134_v33 = vpop.permute.xlu0 %352 }
 0x11c   :  { %v458_v46 = vadd.f32 %v456_v40, %v446_v41  ;;  %v1191_v41 = vmul.f32 %v1061_v8, %v1008_v47 }
 0x11f   :  { %v301_v14 = vpop.permute.xlu1 %300  ;;  %v1151_v43 = vpop.permute.xlu0 %490 }
 0x123   :  { %v463_v26 = vpop.permute.xlu1 %462  ;;  %v1168_v13 = vpop.permute.xlu0 %371 }
 0x124   :  { %v465_v30 = vsel %vm302_vm5, %v463_v26, %v1093_v11 }
 0x125   :  { %v466_v36 = vsel %vm1140_vm7, %v465_v30, 0.0  ;;  %v261_v30 = vsel %vm259_vm3, %v258_v62, %v256_v61  ;;  %vm808_vm3 = vcmask 15368  }
 0x126   :  { %v468_v42 = vmul.f32 %v466_v36, %v1068_v57  ;;  %v283_v36 = vsel %vm281_vm0, %v1083_v63, %v1081_v9  ;;  %v268_v61 = vsel %vm1128_vm6, %v261_v30, 0.0 }
 0x127   :  { %v322_v28 = vpop.permute.xlu1 %321  ;;  %v288_v47 = vsel %vm247_vm1, %v283_v36, 0.0  ;;  %v1210_v31 = vpop.permute.xlu0 %500  ;;  %vm1340_vm1 = vmand %vm250_vm12, %vm1197_vm11 }
 0x128   :  { %v470_v49 = vadd.f32 %v468_v42, %v458_v46  ;;  %v304_v46 = vsel %vm302_vm5, %v301_v14, %v299_v6 }
 0x12b   :  { %v324_v38 = vpop.permute.xlu1 %323 }
 0x12c   :  { %v326_v10 = vsel %vm325_vm8, %v322_v28, %v324_v38 }
 0x12f   :  { %v475_v44 = vpop.permute.xlu1 %474 }
 0x130   :  { %v477_v37 = vsel %vm325_vm8, %v475_v44, %v1099_v25 }
 0x131   :  { %v478_v48 = vsel %vm1103_vm2, %v477_v37, 0.0 }
 0x132   :  { %v480_v39 = vmul.f32 %v478_v48, %v1057_v2  ;;  %v269_v48 = vsel %vm1175_vm10, %v260_v50, 0.0  ;;  %v464_v50 = vsel %vm302_vm5, %v1093_v11, %v463_v26  ;;  %v445_v11 = vsel %vm1175_vm10, %v442_v55, 0.0 }
 0x133   :  { %v1163_v52 = vpop.permute.xlu1 %350  ;;  %v276_v34 = vmul.f32 %v1075_v7, %v269_v48 }
 0x134   :  { %v482_v18 = vadd.f32 %v480_v39, %v470_v49  ;;  %v303_v49 = vsel %vm302_vm5, %v299_v6, %v301_v14  ;;  %v275_v6 = vmul.f32 %v1075_v7, %v268_v61  ;;  %v311_v14 = vsel %vm1140_vm7, %v304_v46, 0.0  ;;  %v395_v61 = vpop.permute.xlu0 %394 }
 0x135   :  { %v312_v1 = vsel %vm1197_vm11, %v303_v49, 0.0  ;;  %v333_v46 = vsel %vm1175_vm10, %v326_v10, 0.0  ;;  %v447_v49 = vmul.f32 %v445_v11, %v1075_v7 }
 0x136   :  { %v486_v29 = vadd.f32 %v484_v54, %v482_v18  ;;  %v282_v54 = vsel %vm281_vm0, %v1081_v9, %v1083_v63  ;;  %v327_v18 = vsel %vm325_vm8, %v324_v38, %v322_v28  ;;  %v294_v9 = vmul.f32 %v1063_v0, %v288_v47 }
 0x137   :  { %v1173_v32 = vpop.permute.xlu1 %488  ;;  %v452_v63 = vsel %vm281_vm0, %v1089_v3, %v1091_v5  ;;  %v332_v26 = vsel %vm1103_vm2, %v327_v18, 0.0  ;;  %v467_v3 = vsel %vm1197_vm11, %v464_v50, 0.0  ;;  %v476_v5 = vsel %vm325_vm8, %v1099_v25, %v475_v44 }
 0x138   :  { %v492_v40 = vsel %vm354_vm9, %v1173_v32, %v1151_v43  ;;  %v457_v38 = vmul.f32 %v452_v63, %v1063_v0  ;;  %v296_v48 = vadd.f32 %v294_v9, %v275_v6  ;;  %v338_v47 = vmul.f32 %v1057_v2, %v332_v26 }
 0x139   :  { %v494_v42 = vsel %vm1112_vm4, %v492_v40, 0.0  ;;  %v317_v40 = vmul.f32 %v1068_v57, %v311_v14  ;;  %v355_v25 = vsel %vm354_vm9, %v1163_v52, %v1134_v33  ;;  %v479_v55 = vsel %vm1175_vm10, %v476_v5, 0.0 }
 0x13a   :  { %v496_v37 = vmul.f32 %v494_v42, %v1066_v56  ;;  %v318_v42 = vmul.f32 %v1068_v57, %v312_v1  ;;  %v339_v6 = vmul.f32 %v1057_v2, %v333_v46  ;;  %v356_v50 = vsel %vm354_vm9, %v1134_v33, %v1163_v52 }
 0x13b   :  { %v374_v39 = vpop.permute.xlu1 %373  ;;  %v319_v14 = vadd.f32 %v317_v40, %v296_v48  ;;  %v459_v63 = vadd.f32 %v457_v38, %v447_v49  ;;  %v361_v7 = vsel %vm1112_vm4, %v355_v25, 0.0  ;;  %v481_v10 = vmul.f32 %v479_v55, %v1057_v2 }
 0x13c   :  { %v498_v30 = vadd.f32 %v496_v37, %v486_v29  ;;  %v295_v29 = vmul.f32 %v1063_v0, %v282_v54  ;;  %v469_v54 = vmul.f32 %v467_v3, %v1068_v57  ;;  %v376_v33 = vsel %vm375_vm13, %v1168_v13, %v374_v39 }
 0x13d   :  { %v340_v57 = vadd.f32 %v338_v47, %v319_v14  ;;  %v377_v52 = vsel %vm375_vm13, %v374_v39, %v1168_v13  ;;  %v362_v35 = vsel %vm1197_vm11, %v356_v50, 0.0  ;;  %v493_v11 = vsel %vm354_vm9, %v1151_v43, %v1173_v32 }
 0x13e   :  { %v297_v0 = vadd.f32 %v295_v29, %v276_v34  ;;  %v471_v2 = vadd.f32 %v469_v54, %v459_v63  ;;  %v513_v29 = vpop.permute.xlu0 %512  ;;  %v367_v3 = vmul.f32 %v1066_v56, %v361_v7  ;;  %v384_v39 = vsel %vm1103_vm2, %v376_v33, 0.0 }
 0x13f   :  { %v503_v36 = vpop.permute.xlu1 %502  ;;  %v385_v5 = vsel %vm1283_vm15, %v377_v52, 0.0  ;;  %v348_v38 = vadd.f32 %v1191_v41, %v340_v57  ;;  %v495_v46 = vsel %vm1197_vm11, %v493_v11, 0.0  ;;  %v390_v25 = vmul.f32 %v1071_v58, %v384_v39 }
 0x140   :  { %v504_v28 = vsel %vm375_vm13, %v1210_v31, %v503_v36  ;;  %v320_v1 = vadd.f32 %v318_v42, %v297_v0  ;;  %v505_v43 = vsel %vm375_vm13, %v503_v36, %v1210_v31  ;;  %v368_v42 = vmul.f32 %v1066_v56, %v362_v35 }
 0x141   :  { %v506_v37 = vsel %vm1103_vm2, %v504_v28, 0.0  ;;  %v483_v28 = vadd.f32 %v481_v10, %v471_v2  ;;  %v391_v41 = vmul.f32 %v1071_v58, %v385_v5  ;;  %v485_v0 = vmul.f32 %v1061_v8, %v1020_v53 }
 0x142   :  { %v508_v44 = vmul.f32 %v506_v37, %v1071_v58  ;;  %v341_v40 = vadd.f32 %v339_v6, %v320_v1  ;;  %v497_v49 = vmul.f32 %v495_v46, %v1066_v56  ;;  %vm419_vm0 = vcmp.lt.s32.totalorder %v1096_v12, 111  ;;  %v525_v52 = vpop.permute.xlu0 %524 }
 0x143   :  { %v397_v18 = vpop.permute.xlu1 %396  ;;  %v487_v53 = vadd.f32 %v485_v0, %v483_v28  ;;  %vm795_vm2 = vcmask 7168  }
 0x144   :  { %v510_v9 = vadd.f32 %v508_v44, %v498_v30  ;;  %v347_v30 = vmul.f32 %v1061_v8, %v1014_v51  ;;  %v400_v13 = vsel %vm398_vm14, %v397_v18, %v395_v61  ;;  %v399_v19 = vsel %vm398_vm14, %v395_v61, %v397_v18 }
 0x145   :  { %v406_v37 = vsel %vm250_vm12, %v400_v13, 0.0  ;;  %v507_v44 = vsel %vm1283_vm15, %v505_v43, 0.0  ;;  %v369_v61 = vadd.f32 %v367_v3, %v348_v38  ;;  %v411_v55 = vmul.f32 %v1073_v4, %v399_v19 }
 0x146   :  { %v349_v47 = vadd.f32 %v347_v30, %v341_v40  ;;  %v412_v18 = vmul.f32 %v1073_v4, %v406_v37  ;;  %v509_v8 = vmul.f32 %v507_v44, %v1071_v58  ;;  %v499_v7 = vadd.f32 %v497_v49, %v487_v53 }
 0x147   :  { %v515_v26 = vpop.permute.xlu1 %514  ;;  %v392_v50 = vadd.f32 %v390_v25, %v369_v61 }
 0x148   :  { %v516_v51 = vsel %vm398_vm14, %v513_v29, %v515_v26  ;;  %v517_v48 = vsel %vm398_vm14, %v515_v26, %v513_v29  ;;  %v370_v54 = vadd.f32 %v368_v42, %v349_v47  ;;  %v511_v30 = vadd.f32 %v509_v8, %v499_v7  ;;  %v557_v47 = vpop.permute.xlu0 %556 }
 0x149   :  { %v520_v32 = vmul.f32 %v516_v51, %v1073_v4  ;;  %v519_v14 = vsel %vm250_vm12, %v517_v48, 0.0  ;;  %v413_v10 = vadd.f32 %v411_v55, %v392_v50 }
 0x14a   :  { %v521_v62 = vmul.f32 %v519_v14, %v1073_v4 }
 0x14b   :  { %v522_v31 = vadd.f32 %v520_v32, %v510_v9  ;;  %v416_v36 = vpop.permute.xlu1 %415  ;;  %v393_v9 = vadd.f32 %v391_v41, %v370_v54 }
 0x14c   :  { %v523_v26 = vadd.f32 %v521_v62, %v511_v30 }
 0x14d   :  { %v414_v58 = vadd.f32 %v412_v18, %v393_v9 }
 0x14f   :  { %v418_v56 = vpop.permute.xlu1 %417 }
 0x150   :  { %v420_v63 = vsel %vm419_vm0, %v416_v36, %v418_v56  ;;  %v421_v1 = vsel %vm419_vm0, %v418_v56, %v416_v36  ;;  %v609_v56 = vpop.permute.xlu0 %608 }
 0x151   :  { %v428_v45 = vsel %vm1112_vm4, %v420_v63, 0.0  ;;  %v429_v57 = vsel %vm1340_vm1, %v421_v1, 0.0 }
 0x152   :  { %v434_v34 = vmul.f32 %v1077_v59, %v428_v45  ;;  %v435_v33 = vmul.f32 %v1077_v59, %v429_v57 }
 0x153   :  { %v527_v2 = vpop.permute.xlu1 %526 }
 0x154   :  { %v436_v29 = vadd.f32 %v434_v34, %v413_v10  ;;  %v437_v35 = vadd.f32 %v435_v33, %v414_v58  ;;  %v528_v4 = vsel %vm419_vm0, %v525_v52, %v527_v2  ;;  %v529_v11 = vsel %vm419_vm0, %v527_v2, %v525_v52 }
 0x155   :  { %v530_v40 = vsel %vm1112_vm4, %v528_v4, 0.0  ;;  %v531_v3 = vsel %vm1340_vm1, %v529_v11, 0.0 }
 0x156   :  { %v542_v13 = vadd.f32 %v1079_v60, %v436_v29  ;;  %v543_v51 = vadd.f32 %v1079_v60, %v437_v35  ;;  %v532_v39 = vmul.f32 %v530_v40, %v1077_v59  ;;  %v533_v5 = vmul.f32 %v531_v3, %v1077_v59 }
 0x158   :  { %v546_v43 = vmax.f32 %v542_v13, 0.0  ;;  %v547_v32 = vmax.f32 %v543_v51, 0.0  ;;  %v534_v28 = vadd.f32 %v532_v39, %v522_v31  ;;  %v535_v12 = vadd.f32 %v533_v5, %v523_v26 }
 0x15a   :  { %v544_v38 = vadd.f32 %v1079_v60, %v534_v28  ;;  %v545_v27 = vadd.f32 %v1079_v60, %v535_v12  ;;  %v1370_v42 = vmin.f32 %v546_v43, 6.0  ;;  %v1372_v46 = vmin.f32 %v547_v32, 6.0  ;;  %v693_v43 = vpop.permute.xlu0 %692 }
 0x15c   :  { %v548_v19 = vmax.f32 %v544_v38, 0.0  ;;  %v549_v37 = vmax.f32 %v545_v27, 0.0  ;;  %v566_v59 = vrot.slane %v1372_v46, %v944_v15  ;;  %v562_v31 = vrot.slane %v1370_v42, %v944_v15 }
 0x15d   :  { %v614_v41 = vrot.slane %v1370_v42, %v948_v17  ;;  %v618_v44 = vrot.slane %v1372_v46, %v948_v17  ;;  %v590_v49 = vrot.slane %v1372_v46, %v960_v21  ;;  %v586_v55 = vrot.slane %v1370_v42, %v960_v21 }
 0x15e   :  { %v1374_v48 = vmin.f32 %v548_v19, 6.0  ;;  %v1376_v36 = vmin.f32 %v549_v37, 6.0  ;;  %v576_v18 = vmul.f32 %v566_v59, %v557_v47  ;;  %v575_v8 = vmul.f32 %v562_v31, %v557_v47 }
 0x15f   :  { %v627_v1 = vmul.f32 %v614_v41, %v609_v56  ;;  %v628_v7 = vmul.f32 %v618_v44, %v609_v56  ;;  %v642_v30 = vrot.slane %v1370_v42, %v964_v23  ;;  %v698_v51 = vrot.slane %v1370_v42, %v962_v22 }
 0x160   :  { %v570_v60 = vrot.slane %v1374_v48, %v944_v15  ;;  %v574_v25 = vrot.slane %v1376_v36, %v944_v15  ;;  %v622_v0 = vrot.slane %v1374_v48, %v948_v17  ;;  %v626_v61 = vrot.slane %v1376_v36, %v948_v17 }
 0x161   :  { %v594_v54 = vrot.slane %v1374_v48, %v960_v21  ;;  %v598_v15 = vrot.slane %v1376_v36, %v960_v21  ;;  %v646_v21 = vrot.slane %v1372_v46, %v964_v23  ;;  %v650_v33 = vrot.slane %v1374_v48, %v964_v23 }
 0x162   :  { %v577_v14 = vmul.f32 %v570_v60, %v557_v47  ;;  %v578_v6 = vmul.f32 %v574_v25, %v557_v47  ;;  %v629_v62 = vmul.f32 %v622_v0, %v609_v56  ;;  %v630_v45 = vmul.f32 %v626_v61, %v609_v56 }
 0x163   :  { %v654_v52 = vrot.slane %v1376_v36, %v964_v23  ;;  %v702_v39 = vrot.slane %v1372_v46, %v962_v22  ;;  %v706_v5 = vrot.slane %v1374_v48, %v962_v22  ;;  %v710_v23 = vrot.slane %v1376_v36, %v962_v22 }
 0x164   :  { %v581_v53 = vpop.permute.xlu1 %580  ;;  %v674_v32 = vrot.slane %v1372_v46, %v946_v16  ;;  %v678_v28 = vrot.slane %v1374_v48, %v946_v16  ;;  %v682_v12 = vrot.slane %v1376_v36, %v946_v16  ;;  %v670_v38 = vrot.slane %v1370_v42, %v946_v16 }
 0x165   :  { %v599_v50 = vmul.f32 %v586_v55, %v581_v53  ;;  %v600_v17 = vmul.f32 %v590_v49, %v581_v53  ;;  %v601_v9 = vmul.f32 %v594_v54, %v581_v53  ;;  %v602_v63 = vmul.f32 %v598_v15, %v581_v53 }
 0x166   :  { %v711_v41 = vmul.f32 %v698_v51, %v693_v43  ;;  %v712_v44 = vmul.f32 %v702_v39, %v693_v43  ;;  %v713_v0 = vmul.f32 %v706_v5, %v693_v43  ;;  %v714_v61 = vmul.f32 %v710_v23, %v693_v43 }
 0x167   :  { %v603_v57 = vadd.f32 %v599_v50, %v575_v8  ;;  %v604_v10 = vadd.f32 %v600_v17, %v576_v18  ;;  %v605_v58 = vadd.f32 %v601_v9, %v577_v14  ;;  %v606_v34 = vadd.f32 %v602_v63, %v578_v6 }
 0x168   :  { %v730_v16 = vrot.slane %v1372_v46, %v958_v20  ;;  %v734_v18 = vrot.slane %v1374_v48, %v958_v20  ;;  %v738_v14 = vrot.slane %v1376_v36, %v958_v20  ;;  %v726_v6 = vrot.slane %v1370_v42, %v958_v20 }
 0x169   :  { %v632_v2 = vadd.f32 %v628_v7, %v604_v10  ;;  %v633_v29 = vadd.f32 %v629_v62, %v605_v58  ;;  %v634_v35 = vadd.f32 %v630_v45, %v606_v34  ;;  %v637_v4 = vpop.permute.xlu1 %636  ;;  %v631_v11 = vadd.f32 %v627_v1, %v603_v57 }
 0x16a   :  { %v655_v26 = vmul.f32 %v642_v30, %v637_v4  ;;  %v656_v40 = vmul.f32 %v646_v21, %v637_v4  ;;  %v657_v3 = vmul.f32 %v650_v33, %v637_v4  ;;  %v658_v13 = vmul.f32 %v654_v52, %v637_v4 }
 0x16b   :  { %v758_v62 = vrot.slane %v1372_v46, %v966_v24  ;;  %v762_v45 = vrot.slane %v1374_v48, %v966_v24  ;;  %v766_v57 = vrot.slane %v1376_v36, %v966_v24  ;;  %v754_v20 = vrot.slane %v1370_v42, %v966_v24 }
 0x16c   :  { %v659_v27 = vadd.f32 %v655_v26, %v631_v11  ;;  %v660_v19 = vadd.f32 %v656_v40, %v632_v2  ;;  %v661_v37 = vadd.f32 %v657_v3, %v633_v29  ;;  %v662_v59 = vadd.f32 %v658_v13, %v634_v35  ;;  %v779_v35 = vpop.permute.xlu0 %778 }
 0x16e   :  { %v665_v31 = vpop.permute.xlu1 %664 }
 0x16f   :  { %v683_v47 = vmul.f32 %v670_v38, %v665_v31  ;;  %v684_v22 = vmul.f32 %v674_v32, %v665_v31  ;;  %v685_v60 = vmul.f32 %v678_v28, %v665_v31  ;;  %v686_v25 = vmul.f32 %v682_v12, %v665_v31 }
 0x171   :  { %v687_v49 = vadd.f32 %v683_v47, %v659_v27  ;;  %v688_v54 = vadd.f32 %v684_v22, %v660_v19  ;;  %v689_v15 = vadd.f32 %v685_v60, %v661_v37  ;;  %v690_v55 = vadd.f32 %v686_v25, %v662_v59 }
 0x173   :  { %v716_v53 = vadd.f32 %v712_v44, %v688_v54  ;;  %v717_v8 = vadd.f32 %v713_v0, %v689_v15  ;;  %v718_v56 = vadd.f32 %v714_v61, %v690_v55  ;;  %v721_v50 = vpop.permute.xlu1 %720  ;;  %v715_v17 = vadd.f32 %v711_v41, %v687_v49 }
 0x174   :  { %v739_v9 = vmul.f32 %v726_v6, %v721_v50  ;;  %v740_v63 = vmul.f32 %v730_v16, %v721_v50  ;;  %v741_v1 = vmul.f32 %v734_v18, %v721_v50  ;;  %v742_v7 = vmul.f32 %v738_v14, %v721_v50 }
 0x176   :  { %v743_v10 = vadd.f32 %v739_v9, %v715_v17  ;;  %v744_v58 = vadd.f32 %v740_v63, %v716_v53  ;;  %v745_v34 = vadd.f32 %v741_v1, %v717_v8  ;;  %v746_v21 = vadd.f32 %v742_v7, %v718_v56 }
 0x178   :  { %v749_v33 = vpop.permute.xlu1 %748 }
 0x179   :  { %v767_v52 = vmul.f32 %v754_v20, %v749_v33  ;;  %v768_v30 = vmul.f32 %v758_v62, %v749_v33  ;;  %v769_v2 = vmul.f32 %v762_v45, %v749_v33  ;;  %v770_v29 = vmul.f32 %v766_v57, %v749_v33 }
 0x17b   :  { %v771_v46 = vadd.f32 %v767_v52, %v743_v10  ;;  %v772_v4 = vadd.f32 %v768_v30, %v744_v58  ;;  %v773_v11 = vadd.f32 %v769_v2, %v745_v34  ;;  %v774_v48 = vadd.f32 %v770_v29, %v746_v21 }
 0x17d   :  { %v781_v26 = vadd.f32 %v779_v35, %v771_v46  ;;  %v782_v40 = vadd.f32 %v779_v35, %v772_v4  ;;  %v783_v36 = vadd.f32 %v779_v35, %v773_v11  ;;  %v784_v3 = vadd.f32 %v779_v35, %v774_v48 }
 0x17f   :  { %785 = vst [vmem:[%s1473_s7] sm:$0xff] %v781_v26  ;;  %786 = vst [vmem:[%s1473_s7 + $0x8] sm:$0xff] %v782_v40  ;;  %v792_v24 = vadd.f32 %v784_v3, %v783_v36  ;;  %v789_v42 = vadd.f32 %v782_v40, %v781_v26  ;;  %v800_v13 = vmul.f32 %v783_v36, %v783_v36 }
 0x180   :  { %787 = vst [vmem:[%s1473_s7 + $0x10] sm:$0xff] %v783_v36  ;;  %788 = vst [vmem:[%s1473_s7 + $0x18] sm:$0xff] %v784_v3  ;;  %v801_v51 = vmul.f32 %v784_v3, %v784_v3  ;;  %v798_v39 = vmul.f32 %v781_v26, %v781_v26  ;;  %v799_v5 = vmul.f32 %v782_v40, %v782_v40 }
 0x181   :  { %793 = vadd.xlane.f32.xlu0 %v792_v24  ;;  %790 = vadd.xlane.f32.xlu1 %v789_v42 }
 0x182   :  { %v805_v23 = vadd.f32 %v801_v51, %v800_v13  ;;  %v802_v43 = vadd.f32 %v799_v5, %v798_v39 }
 0x185   :  { %806 = vadd.xlane.f32.xlu0 %v805_v23  ;;  %803 = vadd.xlane.f32.xlu1 %v802_v43 }
 0x20e   :  { %v794_v32 = vpop.xlane.xlu0 %793  ;;  %v791_v28 = vpop.xlane.xlu1 %790 }
 0x20f   :  { %797 = vst.msk [vmem:[%s1474_s8 + $0x8] sm:$0xff] %vm795_vm2, %v794_v32  ;;  %796 = vst.msk [vmem:[%s1474_s8] sm:$0xff] %vm795_vm2, %v791_v28 }
 0x212   :  { %v807_v12 = vpop.xlane.xlu0 %806  ;;  %v804_v38 = vpop.xlane.xlu1 %803 }
 0x213   :  { %810 = vst.msk [vmem:[%s1474_s8 + $0x8] sm:$0xff] %vm808_vm3, %v807_v12  ;;  %809 = vst.msk [vmem:[%s1474_s8] sm:$0xff] %vm808_vm3, %v804_v38 }

</bundles_post_ra>
